<compile_context>
chip_gen: v7x
topology: tpu7x:2x2x1
jax: 0.10.0
libtpu: 0.0.40
codegen_flags: <defaults>
</compile_context>

<pallas_src>
import functools

import jax
import jax.numpy as jnp
from jax import lax
from jax.experimental import pallas as pl
from jax.experimental.pallas import tpu as pltpu


def _bottleneck_kernel(x_ref, w1_ref, w2_ref, w3_ref, b1_ref, b2_ref, b3_ref,
                       o_ref, *, Hb, W, P):
    # x_ref : ((Hb+2)*W, Cin) bf16  rows = [top halo row | Hb block rows | bottom halo row]
    # w1_ref: (Cin, P)   bf16 (BN1 scale folded)
    # w2_ref: (9P, P)    bf16 (BN2 scale folded, tap-major K stacking)
    # w3_ref: (P, Cout)  bf16 (BN3 scale folded)
    # b*_ref: (1, C)     f32
    # o_ref : (Hb*W, Cout) bf16
    rb = pl.program_id(1)
    nrb = pl.num_programs(1)

    xb = x_ref[...]                                      # bf16
    # Identity branch: the block's own (dense) rows, a contiguous slice.
    ident = xb[W:(Hb + 1) * W, :].astype(jnp.float32)    # (Hb*W, Cout)

    # ---- conv1 (1x1) + bn1 + relu on block rows AND the 2 halo rows ---------
    h1 = jnp.dot(xb, w1_ref[...], preferred_element_type=jnp.float32)
    h1 = jnp.maximum(h1 + b1_ref[...], 0.0)              # ((Hb+2)*W, P) f32

    # Halo rows that fall outside the image are conv2's zero padding, not real
    # activations (the host feeds zero x rows there, but relu(conv1(0)+b1) =
    # relu(b1) != 0), so zero them explicitly at the image boundary.
    row = lax.broadcasted_iota(jnp.int32, ((Hb + 2) * W, 1), 0)
    is_pad = ((row < W) & (rb == 0)) | ((row >= (Hb + 1) * W) & (rb == nrb - 1))
    h1 = jnp.where(is_pad, 0.0, h1)

    # ---- conv2 (3x3, stride=1, pad=1) + bn2 + relu ---------------------------
    # Single K-stacked im2col matmul (K = 9P).  The patch is built once,
    # directly from the h1 value (no staging scratch / double materialization).
    h1b = h1.astype(jnp.bfloat16).reshape(Hb + 2, W, P)
    zc = jnp.zeros((Hb + 2, 1, P), jnp.bfloat16)
    h1p = jnp.concatenate([zc, h1b, zc], axis=1)          # (Hb+2, W+2, P)
    cols = [h1p[ky:ky + Hb, kx:kx + W, :]
            for ky in range(3) for kx in range(3)]
    patch = jnp.concatenate(cols, axis=-1).reshape(Hb * W, 9 * P)     # bf16
    h2 = jnp.dot(patch, w2_ref[...], preferred_element_type=jnp.float32)
    h2 = jnp.maximum(h2 + b2_ref[...], 0.0)               # (Hb*W, P) f32

    # ---- conv3 (1x1) + bn3, residual add, relu; lane-dense bf16 store -------
    h3 = jnp.dot(h2.astype(jnp.bfloat16), w3_ref[...],
                 preferred_element_type=jnp.float32)
    o_ref[...] = jnp.maximum(h3 + b3_ref[...] + ident, 0.0).astype(o_ref.dtype)


def bottleneck(x, w1_hwio, w2_hwio, w3_hwio, s1, b1, s2, b2, s3, b3, *,
               block_rows=8):
    """x: (N, H, W, Cin) f32; conv weights HWIO; s*/b* folded-BN scale/bias.

    block_rows (Hb): output rows per grid step.  For production shapes pick
    Hb so Hb*W >= 512 (amortizes MXU weight pushes) while keeping H % Hb == 0.
    """
    N, H, W, Cin = x.shape
    P = w1_hwio.shape[-1]
    Cout = w3_hwio.shape[-1]
    Hb = min(block_rows, H)
    assert H % Hb == 0, "block_rows must divide H"
    nRB = H // Hb

    # Preconditions of the implemented configuration (stride=1, pad=1, no
    # downsample, identity residual).
    assert w1_hwio.shape == (1, 1, Cin, P)
    assert w2_hwio.shape == (3, 3, P, P)
    assert w3_hwio.shape == (1, 1, P, Cout)
    assert Cin == Cout, "identity residual needs inplanes == planes*expansion"

    # Host-side prep: fold BN scales into conv weights (bf16), keep biases f32.
    w1 = (w1_hwio.reshape(Cin, P) * s1[None, :]).astype(jnp.bfloat16)
    w2 = (w2_hwio * s2[None, None, None, :]).reshape(9 * P, P).astype(jnp.bfloat16)
    w3 = (w3_hwio.reshape(P, Cout) * s3[None, :]).astype(jnp.bfloat16)
    b1k = b1.reshape(1, P).astype(jnp.float32)
    b2k = b2.reshape(1, P).astype(jnp.float32)
    b3k = b3.reshape(1, Cout).astype(jnp.float32)

    # Activations cross HBM in bf16.  Each row block carries its 2 conv2 halo
    # rows (zero rows at the image boundary; masked in-kernel).
    xb16 = x.astype(jnp.bfloat16)
    xpad = jnp.pad(xb16, ((0, 0), (1, 1), (0, 0), (0, 0)))
    ridx = jnp.arange(nRB)[:, None] * Hb + jnp.arange(Hb + 2)[None, :]
    xblk = xpad[:, ridx].reshape(N, nRB, (Hb + 2) * W, Cin)

    flops = 2 * N * H * W * (Cin * P + 9 * P * P + P * Cout)
    bytes_accessed = ((xblk.size + N * H * W * Cout) * 2
                      + (w1.size + w2.size + w3.size) * 2
                      + (2 * P + Cout) * 4)

    kernel = functools.partial(_bottleneck_kernel, Hb=Hb, W=W, P=P)

    out = pl.pallas_call(
        kernel,
        out_shape=jax.ShapeDtypeStruct((N, H * W, Cout), jnp.bfloat16),
        grid_spec=pltpu.PrefetchScalarGridSpec(
            num_scalar_prefetch=0,
            grid=(N, nRB),                                # image x row-block
            in_specs=[
                pl.BlockSpec((None, None, (Hb + 2) * W, Cin),
                             lambda n, r: (n, r, 0, 0)),              # x block
                pl.BlockSpec((Cin, P), lambda n, r: (0, 0)),          # w1 (resident)
                pl.BlockSpec((9 * P, P), lambda n, r: (0, 0)),        # w2 (resident)
                pl.BlockSpec((P, Cout), lambda n, r: (0, 0)),         # w3 (resident)
                pl.BlockSpec((1, P), lambda n, r: (0, 0)),            # b1
                pl.BlockSpec((1, P), lambda n, r: (0, 0)),            # b2
                pl.BlockSpec((1, Cout), lambda n, r: (0, 0)),         # b3
            ],
            out_specs=pl.BlockSpec((None, Hb * W, Cout), lambda n, r: (n, r, 0)),
        ),
        compiler_params=pltpu.CompilerParams(
            dimension_semantics=("parallel", "parallel"),
            vmem_limit_bytes=32 * 1024 * 1024,
        ),
        cost_estimate=pl.CostEstimate(flops=flops, transcendentals=0,
                                      bytes_accessed=bytes_accessed),
    )(xblk, w1, w2, w3, b1k, b2k, b3k)

    return out.reshape(N, H, W, Cout)


def reference(x, w1f_hwio, w2f_hwio, w3f_hwio, b1, b2, b3):
    """Pure-JAX eval-mode forward with BN scale folded into the (f32) weights
    and the same bf16 rounding of matmul inputs / residual as the kernel
    (f32 accumulation via HIGHEST-precision convs)."""
    q = lambda a: a.astype(jnp.bfloat16).astype(jnp.float32)
    dn = ('NHWC', 'HWIO', 'NHWC')
    hp = lax.Precision.HIGHEST
    h = lax.conv_general_dilated(q(x), q(w1f_hwio), (1, 1), 'VALID',
                                 dimension_numbers=dn, precision=hp)
    h = jnp.maximum(h + b1, 0.0)
    h = lax.conv_general_dilated(q(h), q(w2f_hwio), (1, 1), ((1, 1), (1, 1)),
                                 dimension_numbers=dn, precision=hp)
    h = jnp.maximum(h + b2, 0.0)
    h = lax.conv_general_dilated(q(h), q(w3f_hwio), (1, 1), 'VALID',
                                 dimension_numbers=dn, precision=hp)
    # The kernel's residual branch uses the bf16 activations crossing HBM.
    return jnp.maximum(h + b3 + q(x), 0.0)


def fold_bn(gamma, beta, mean, var, eps=1e-5):
    scale = gamma / jnp.sqrt(var + eps)
    bias = beta - mean * scale
    return scale, bias


if __name__ == "__main__":
    key = jax.random.PRNGKey(0)
    N, H, Wd = 2, 16, 16
    planes = 64                         # realistic ResNet-50 layer1 width
    expansion = 4
    inplanes = planes * expansion       # 256, so residual add is well-formed
    Cout = planes * expansion           # 256 (multiple of 128 -> lane-dense)

    ks = jax.random.split(key, 16)
    x = jax.random.normal(ks[0], (N, H, Wd, inplanes), jnp.float32)

    # Conv weights (HWIO layout; PyTorch OIHW maps via transpose(2,3,1,0)).
    w1_hwio = jax.random.normal(ks[1], (1, 1, inplanes, planes), jnp.float32) * 0.05
    w2_hwio = jax.random.normal(ks[2], (3, 3, planes, planes), jnp.float32) * 0.05
    w3_hwio = jax.random.normal(ks[3], (1, 1, planes, Cout), jnp.float32) * 0.05

    # BatchNorm parameters (eval-mode running stats), folded to scale/bias.
    def bn_params(kg, kb, km, kv, c):
        gamma = 0.5 + jax.random.uniform(kg, (c,), jnp.float32)
        beta = jax.random.normal(kb, (c,), jnp.float32) * 0.1
        mean = jax.random.normal(km, (c,), jnp.float32) * 0.1
        var = 0.5 + jax.random.uniform(kv, (c,), jnp.float32)
        return fold_bn(gamma, beta, mean, var)

    s1, b1 = bn_params(ks[4], ks[5], ks[6], ks[7], planes)
    s2, b2 = bn_params(ks[8], ks[9], ks[10], ks[11], planes)
    s3, b3 = bn_params(ks[12], ks[13], ks[14], ks[15], Cout)

    out = bottleneck(x, w1_hwio, w2_hwio, w3_hwio, s1, b1, s2, b2, s3, b3,
                     block_rows=8)
    out = jax.block_until_ready(out)

    # Reference uses the same BN-folded weights (identical math to bn(conv(x))).
    w1f = w1_hwio * s1[None, None, None, :]
    w2f = w2_hwio * s2[None, None, None, :]
    w3f = w3_hwio * s3[None, None, None, :]
    ref = jax.block_until_ready(reference(x, w1f, w2f, w3f, b1, b2, b3))

    assert out.shape == (N, H, Wd, Cout)
    assert out.dtype == jnp.bfloat16
    outf = out.astype(jnp.float32)
    max_err = jnp.max(jnp.abs(outf - ref))
    assert jnp.allclose(outf, ref, atol=3e-2, rtol=3e-2), \
        f"max abs err {max_err}"
    print("KERNEL_OK")
</pallas_src>

<mosaic_0001>
module attributes {stable_mosaic.version = 11 : i64} {
  func.func @_bottleneck_kernel(%arg0: i32, %arg1: i32, %arg2: memref<1x1x160x256xbf16, #tpu.memory_space<vmem>>, %arg3: memref<256x64xbf16, #tpu.memory_space<vmem>>, %arg4: memref<576x64xbf16, #tpu.memory_space<vmem>>, %arg5: memref<64x256xbf16, #tpu.memory_space<vmem>>, %arg6: memref<1x64xf32, #tpu.memory_space<vmem>>, %arg7: memref<1x64xf32, #tpu.memory_space<vmem>>, %arg8: memref<1x256xf32, #tpu.memory_space<vmem>>, %arg9: memref<1x128x256xbf16, #tpu.memory_space<vmem>>) attributes {dimension_semantics = [#tpu.dimension_semantics<parallel>, #tpu.dimension_semantics<parallel>], iteration_bounds = array<i64: 2, 2>, scalar_prefetch = 0 : i64, scratch_operands = 0 : i64, tpu.core_type = #tpu.core_type<tc>, window_params = [{transform_indices = @transform_0, window_bounds = array<i64: 1, 1, 160, 256>}, {pipeline_mode = #tpu.pipeline_mode<synchronous>, transform_indices = @transform_1, window_bounds = array<i64: 256, 64>}, {pipeline_mode = #tpu.pipeline_mode<synchronous>, transform_indices = @transform_2, window_bounds = array<i64: 576, 64>}, {pipeline_mode = #tpu.pipeline_mode<synchronous>, transform_indices = @transform_3, window_bounds = array<i64: 64, 256>}, {pipeline_mode = #tpu.pipeline_mode<synchronous>, transform_indices = @transform_4, window_bounds = array<i64: 1, 64>}, {pipeline_mode = #tpu.pipeline_mode<synchronous>, transform_indices = @transform_5, window_bounds = array<i64: 1, 64>}, {pipeline_mode = #tpu.pipeline_mode<synchronous>, transform_indices = @transform_6, window_bounds = array<i64: 1, 256>}, {transform_indices = @transform_7, window_bounds = array<i64: 1, 128, 256>}]} {
    %c0 = arith.constant 0 : index
    %c0_0 = arith.constant 0 : index
    %c0_1 = arith.constant 0 : index
    %c0_2 = arith.constant 0 : index
    %0 = vector.load %arg2[%c0, %c0_0, %c0_1, %c0_2] : memref<1x1x160x256xbf16, #tpu.memory_space<vmem>>, vector<1x1x160x256xbf16>
    %1 = vector.shape_cast %0 : vector<1x1x160x256xbf16> to vector<160x256xbf16>
    %2 = vector.extract_strided_slice %1 {offsets = [16, 0], sizes = [128, 256], strides = [1, 1]} : vector<160x256xbf16> to vector<128x256xbf16>
    %3 = arith.extf %2 : vector<128x256xbf16> to vector<128x256xf32>
    %c0_3 = arith.constant 0 : index
    %c0_4 = arith.constant 0 : index
    %4 = vector.load %arg3[%c0_3, %c0_4] : memref<256x64xbf16, #tpu.memory_space<vmem>>, vector<256x64xbf16>
    %cst = arith.constant dense<0.000000e+00> : vector<160x64xf32>
    %5 = tpu.matmul %1, %4, %cst {dimension_numbers = #tpu.dot_dimension_numbers<[1], [0], [0], [1], [0, 0, 1, 1], [], []>} : vector<160x256xbf16>, vector<256x64xbf16>, vector<160x64xf32> -> vector<160x64xf32>
    %c0_5 = arith.constant 0 : index
    %c0_6 = arith.constant 0 : index
    %6 = vector.load %arg6[%c0_5, %c0_6] : memref<1x64xf32, #tpu.memory_space<vmem>>, vector<1x64xf32>
    %7 = vector.broadcast %6 : vector<1x64xf32> to vector<160x64xf32>
    %8 = arith.addf %5, %7 : vector<160x64xf32>
    %cst_7 = arith.constant 0.000000e+00 : f32
    %9 = vector.broadcast %cst_7 : f32 to vector<160x64xf32>
    %10 = arith.maximumf %8, %9 : vector<160x64xf32>
    %11 = tpu.iota {dimensions = array<i32: 0>} : vector<160x1xi32>
    %c16_i32 = arith.constant 16 : i32
    %12 = vector.broadcast %c16_i32 : i32 to vector<160x1xi32>
    %13 = arith.cmpi slt, %11, %12 : vector<160x1xi32>
    %c0_i32 = arith.constant 0 : i32
    %14 = arith.cmpi eq, %arg1, %c0_i32 : i32
    %15 = vector.broadcast %14 : i1 to vector<160x1xi1>
    %16 = arith.andi %13, %15 : vector<160x1xi1>
    %c144_i32 = arith.constant 144 : i32
    %17 = vector.broadcast %c144_i32 : i32 to vector<160x1xi32>
    %18 = arith.cmpi sge, %11, %17 : vector<160x1xi32>
    %c1_i32 = arith.constant 1 : i32
    %19 = arith.cmpi eq, %arg1, %c1_i32 : i32
    %20 = vector.broadcast %19 : i1 to vector<160x1xi1>
    %21 = arith.andi %18, %20 : vector<160x1xi1>
    %22 = arith.ori %16, %21 : vector<160x1xi1>
    %cst_8 = arith.constant 0.000000e+00 : f32
    %23 = vector.shape_cast %22 : vector<160x1xi1> to vector<160x1xi1>
    %24 = vector.broadcast %23 : vector<160x1xi1> to vector<160x64xi1>
    %25 = vector.broadcast %cst_8 : f32 to vector<160x64xf32>
    %26 = arith.select %24, %25, %10 : vector<160x64xi1>, vector<160x64xf32>
    %27 = arith.truncf %26 : vector<160x64xf32> to vector<160x64xbf16>
    %28 = vector.shape_cast %27 : vector<160x64xbf16> to vector<10x16x64xbf16>
    %cst_9 = arith.constant 0.000000e+00 : bf16
    %29 = vector.broadcast %cst_9 : bf16 to vector<10x1x64xbf16>
    %30 = tpu.concatenate %29, %28, %29 in 1 : vector<10x1x64xbf16>, vector<10x16x64xbf16>, vector<10x1x64xbf16> -> vector<10x18x64xbf16>
    %31 = vector.extract_strided_slice %30 {offsets = [0, 0, 0], sizes = [8, 16, 64], strides = [1, 1, 1]} : vector<10x18x64xbf16> to vector<8x16x64xbf16>
    %32 = vector.extract_strided_slice %30 {offsets = [0, 1, 0], sizes = [8, 16, 64], strides = [1, 1, 1]} : vector<10x18x64xbf16> to vector<8x16x64xbf16>
    %33 = vector.extract_strided_slice %30 {offsets = [0, 2, 0], sizes = [8, 16, 64], strides = [1, 1, 1]} : vector<10x18x64xbf16> to vector<8x16x64xbf16>
    %34 = vector.extract_strided_slice %30 {offsets = [1, 0, 0], sizes = [8, 16, 64], strides = [1, 1, 1]} : vector<10x18x64xbf16> to vector<8x16x64xbf16>
    %35 = vector.extract_strided_slice %30 {offsets = [1, 1, 0], sizes = [8, 16, 64], strides = [1, 1, 1]} : vector<10x18x64xbf16> to vector<8x16x64xbf16>
    %36 = vector.extract_strided_slice %30 {offsets = [1, 2, 0], sizes = [8, 16, 64], strides = [1, 1, 1]} : vector<10x18x64xbf16> to vector<8x16x64xbf16>
    %37 = vector.extract_strided_slice %30 {offsets = [2, 0, 0], sizes = [8, 16, 64], strides = [1, 1, 1]} : vector<10x18x64xbf16> to vector<8x16x64xbf16>
    %38 = vector.extract_strided_slice %30 {offsets = [2, 1, 0], sizes = [8, 16, 64], strides = [1, 1, 1]} : vector<10x18x64xbf16> to vector<8x16x64xbf16>
    %39 = vector.extract_strided_slice %30 {offsets = [2, 2, 0], sizes = [8, 16, 64], strides = [1, 1, 1]} : vector<10x18x64xbf16> to vector<8x16x64xbf16>
    %40 = tpu.concatenate %31, %32, %33, %34, %35, %36, %37, %38, %39 in 2 : vector<8x16x64xbf16>, vector<8x16x64xbf16>, vector<8x16x64xbf16>, vector<8x16x64xbf16>, vector<8x16x64xbf16>, vector<8x16x64xbf16>, vector<8x16x64xbf16>, vector<8x16x64xbf16>, vector<8x16x64xbf16> -> vector<8x16x576xbf16>
    %41 = vector.shape_cast %40 : vector<8x16x576xbf16> to vector<128x576xbf16>
    %c0_10 = arith.constant 0 : index
    %c0_11 = arith.constant 0 : index
    %42 = vector.load %arg4[%c0_10, %c0_11] : memref<576x64xbf16, #tpu.memory_space<vmem>>, vector<576x64xbf16>
    %cst_12 = arith.constant dense<0.000000e+00> : vector<128x64xf32>
    %43 = tpu.matmul %41, %42, %cst_12 {dimension_numbers = #tpu.dot_dimension_numbers<[1], [0], [0], [1], [0, 0, 1, 1], [], []>} : vector<128x576xbf16>, vector<576x64xbf16>, vector<128x64xf32> -> vector<128x64xf32>
    %c0_13 = arith.constant 0 : index
    %c0_14 = arith.constant 0 : index
    %44 = vector.load %arg7[%c0_13, %c0_14] : memref<1x64xf32, #tpu.memory_space<vmem>>, vector<1x64xf32>
    %45 = vector.broadcast %44 : vector<1x64xf32> to vector<128x64xf32>
    %46 = arith.addf %43, %45 : vector<128x64xf32>
    %cst_15 = arith.constant 0.000000e+00 : f32
    %47 = vector.broadcast %cst_15 : f32 to vector<128x64xf32>
    %48 = arith.maximumf %46, %47 : vector<128x64xf32>
    %49 = arith.truncf %48 : vector<128x64xf32> to vector<128x64xbf16>
    %c0_16 = arith.constant 0 : index
    %c0_17 = arith.constant 0 : index
    %50 = vector.load %arg5[%c0_16, %c0_17] : memref<64x256xbf16, #tpu.memory_space<vmem>>, vector<64x256xbf16>
    %cst_18 = arith.constant dense<0.000000e+00> : vector<128x256xf32>
    %51 = tpu.matmul %49, %50, %cst_18 {dimension_numbers = #tpu.dot_dimension_numbers<[1], [0], [0], [1], [0, 0, 1, 1], [], []>} : vector<128x64xbf16>, vector<64x256xbf16>, vector<128x256xf32> -> vector<128x256xf32>
    %c0_19 = arith.constant 0 : index
    %c0_20 = arith.constant 0 : index
    %52 = vector.load %arg8[%c0_19, %c0_20] : memref<1x256xf32, #tpu.memory_space<vmem>>, vector<1x256xf32>
    %53 = vector.broadcast %52 : vector<1x256xf32> to vector<128x256xf32>
    %54 = arith.addf %51, %53 : vector<128x256xf32>
    %55 = arith.addf %54, %3 : vector<128x256xf32>
    %cst_21 = arith.constant 0.000000e+00 : f32
    %56 = vector.broadcast %cst_21 : f32 to vector<128x256xf32>
    %57 = arith.maximumf %55, %56 : vector<128x256xf32>
    %58 = arith.truncf %57 : vector<128x256xf32> to vector<128x256xbf16>
    %c0_22 = arith.constant 0 : index
    %c0_23 = arith.constant 0 : index
    %c0_24 = arith.constant 0 : index
    %59 = vector.load %arg9[%c0_22, %c0_23, %c0_24] : memref<1x128x256xbf16, #tpu.memory_space<vmem>>, vector<1x128x256xbf16>
    %60 = vector.shape_cast %59 : vector<1x128x256xbf16> to vector<128x256xbf16>
    %61 = vector.shape_cast %58 : vector<128x256xbf16> to vector<1x128x256xbf16>
    tpu.vector_store %arg9[%c0_22, %c0_23, %c0_24], %61 {strides = array<i32>} : memref<1x128x256xbf16, #tpu.memory_space<vmem>>, vector<1x128x256xbf16>,
    return
  }
  func.func @transform_0(%arg0: i32, %arg1: i32) -> (i32, i32, i32, i32) {
    %c0_i32 = arith.constant 0 : i32
    %c0_i32_0 = arith.constant 0 : i32
    %c0_i32_1 = arith.constant 0 : i32
    return %arg0, %arg1, %c0_i32, %c0_i32_0 : i32, i32, i32, i32
  }
  func.func @transform_1(%arg0: i32, %arg1: i32) -> (i32, i32) {
    %c0_i32 = arith.constant 0 : i32
    %c0_i32_0 = arith.constant 0 : i32
    %c0_i32_1 = arith.constant 0 : i32
    return %c0_i32, %c0_i32_0 : i32, i32
  }
  func.func @transform_2(%arg0: i32, %arg1: i32) -> (i32, i32) {
    %c0_i32 = arith.constant 0 : i32
    %c0_i32_0 = arith.constant 0 : i32
    %c0_i32_1 = arith.constant 0 : i32
    return %c0_i32, %c0_i32_0 : i32, i32
  }
  func.func @transform_3(%arg0: i32, %arg1: i32) -> (i32, i32) {
    %c0_i32 = arith.constant 0 : i32
    %c0_i32_0 = arith.constant 0 : i32
    %c0_i32_1 = arith.constant 0 : i32
    return %c0_i32, %c0_i32_0 : i32, i32
  }
  func.func @transform_4(%arg0: i32, %arg1: i32) -> (i32, i32) {
    %c0_i32 = arith.constant 0 : i32
    %c0_i32_0 = arith.constant 0 : i32
    %c0_i32_1 = arith.constant 0 : i32
    return %c0_i32, %c0_i32_0 : i32, i32
  }
  func.func @transform_5(%arg0: i32, %arg1: i32) -> (i32, i32) {
    %c0_i32 = arith.constant 0 : i32
    %c0_i32_0 = arith.constant 0 : i32
    %c0_i32_1 = arith.constant 0 : i32
    return %c0_i32, %c0_i32_0 : i32, i32
  }
  func.func @transform_6(%arg0: i32, %arg1: i32) -> (i32, i32) {
    %c0_i32 = arith.constant 0 : i32
    %c0_i32_0 = arith.constant 0 : i32
    %c0_i32_1 = arith.constant 0 : i32
    return %c0_i32, %c0_i32_0 : i32, i32
  }
  func.func @transform_7(%arg0: i32, %arg1: i32) -> (i32, i32, i32) {
    %c0_i32 = arith.constant 0 : i32
    %c0_i32_0 = arith.constant 0 : i32
    return %arg0, %arg1, %c0_i32 : i32, i32, i32
  }
}

</mosaic_0001>

<bundles_post_ra>
// kernel: tpu_custom_call.1
= control target key start
LH: loop header
LB: loop body
LE: loop exit
PB: predicated region body
PF: predicated region fallthrough
CT: control target
= control target key end

     0   :  { %s4105_s0 = inlined_call_operand.vmem [shape: bf16[2,2,160,256], index: 0, kind: input, shape index: {}]   ;;  %s4106_s1 = inlined_call_operand.vmem [shape: bf16[256,64], index: 1, kind: input, shape index: {}]   ;;  %s4107_s2 = inlined_call_operand.vmem [shape: bf16[576,64], index: 2, kind: input, shape index: {}]   ;;  %s4108_s3 = inlined_call_operand.hbm [shape: bf16[64,256], index: 3, kind: input, shape index: {}]   ;;  %s4109_s4 = inlined_call_operand.vmem [shape: f32[1,64], index: 4, kind: input, shape index: {}]   ;;  %s4110_s5 = inlined_call_operand.vmem [shape: f32[1,64], index: 5, kind: input, shape index: {}]   ;;  %s4111_s6 = inlined_call_operand.vmem [shape: f32[1,256], index: 6, kind: input, shape index: {}]   ;;  %s4112_s7 = inlined_call_operand.hbm [shape: bf16[2,256,256], index: 7, kind: output, shape index: {}]  }
   0x1   :  { %4119 = sst [smem:[#allocation10_spill]] %s4108_s3 }
   0x2   :  { %12 = vsyncpa [#allocation3], 0 }
   0x3   :  { %13 = vsyncpa [#allocation4], 0 }
   0x4   :  { %15 = vsyncpa [#allocation4 + $0x1], 0  ;;  %s3251_s24 = smov 0   ;;  %s3253_s25 = smov 0  }
   0x5   :  { %s3255_s26 = smov 0   ;;  %s3257_s27 = smov 0  }
   0x6   :  { %s3259_s28 = smov 0   ;;  %s3261_s29 = smov 0  }
   0x7   :  { %s3263_s30 = smov 0   ;;  %s3265_s8 = smov 0  }
   0x8 LB: > { %s2488_s9 = sadd.s32 4294967295, %s3201_s8   ;;  %s2489_s10 = sadd.s32 4294967294, %s3201_s8   ;;  %s3201_s8 = sphi %s3265_s8, %s21_s8   ;;  %s3197_s30 = sphi %s3263_s30, %s4144_s30   ;;  %s3193_s29 = sphi %s3261_s29, %s4143_s29   ;;  %s3189_s28 = sphi %s3259_s28, %s4142_s28   ;;  %s3185_s27 = sphi %s3257_s27, %s4141_s27   ;;  %s3181_s26 = sphi %s3255_s26, %s4140_s26   ;;  %s3177_s25 = sphi %s3253_s25, %s4139_s25   ;;  %s3173_s24 = sphi %s3251_s24, %s4138_s24  }
   0x9   : > { %s30_s11 = sadd.s32 1, %s3193_s29  ;;  %s33_s12 = sadd.s32 1, %s3197_s30 }
   0xa   : > { %p31_p0 = scmp.ge.s32.totalorder %s30_s11, 2  ;;  %s196_s13 = sadd.s32 1, %s3181_s26 }
   0xb   : > { %p206_p1 = scmp.ne.s32.totalorder %s3181_s26, %s3177_s25  ;;  %p207_p2 = scmp.eq.s32.totalorder %s2488_s9, 3 }
   0xc   : > { %s4146_s11 = smov (%p31_p0, %s30_s11), 0  ;;  %s4148_s12 = smov (!%p31_p0, %s33_s12), %s3197_s30 }
   0xd   : > { %4120 = sst [smem:[#allocation8_spill]] %s4146_s11  ;;  %s192_s14 = ssub.s32 %s3193_s29, %s4146_s11 }
   0xe   : > { %p3303_p3 = por %p207_p2, %p206_p1  ;;  %p35_p4 = scmp.ge.s32.totalorder %s4148_s12, 2 }
   0xf   : > { %p212_p5 = scmp.ne.s32.totalorder %s3177_s25, %s3173_s24  ;;  %p213_p6 = scmp.eq.s32.totalorder %s2489_s10, 3 }
  0x10   : > { %s4121_s15 = scalar_select %p3303_p3, 1, 0 }
  0x11   : > { %p2490_p7 = scmp.ge.s32.totalorder %s3201_s8, 1  ;;  %s4150_s12 = smov (%p35_p4, %s4148_s12), 0 }
  0x12   : > { %4122 = sst [smem:[#allocation9_spill]] %s4150_s12  ;;  %p3312_p8 = por %p213_p6, %p212_p5 }
  0x13   : > { %p220_p9 = scmp.lt.s32.totalorder %s3201_s8, 5  ;;  %s191_s17 = ssub.s32 %s3197_s30, %s4150_s12 }
  0x14   : > { %s4123_s16 = scalar_select %p3312_p8, 1, 0 }
  0x15   : > { %s193_s18 = sor.u32 %s192_s14, %s191_s17  ;;  %p3319_p10 = pnand %p2490_p7, %p220_p9 }
  0x16   : > { %p194_p11 = scmp.eq.s32.totalorder %s193_s18, 0  ;;  %p3323_p12 = scmp.eq.s32.totalorder %s2488_s9, 0 }
  0x17   : > { %s4124_s19 = scalar_select %p3319_p10, 1, 0 }
  0x18   : > { %s4125_s20 = scalar_select %p3323_p12, 1, 0 }
  0x19   : > { %p2891_p13 = pneg %p3319_p10  ;;  %s3203_s22 = smov [#allocation2]  }
  0x1a   : > { %s3330_s21 = scalar_select %p194_p11, %s3181_s26, %s196_s13  }
  0x1b   : > { %s238_s23 = sshll.u32 %s3203_s22, 4  ;;  %p3334_p0 = pnand %p3323_p12, %p2891_p13  ;;  %s239_s23 = int_to_ptr.vmem [resolvable:$true] %s238_s23 }
  0x1c   : > { %s4127_s3 = sld [smem:[#allocation10_spill]] }
  0x1d   : > { %p3077_p2 = pneg %p3334_p0 }
  0x22   : > { %s3075_s9 = scalar_lea.hbm %s4127_s3, 1024 }
  0x23   : > { %p3076_p1 = scmp.ne.s32.totalorder %s4127_s3, %s3075_s9  ;;  %p3082_p6 = scmp.lt.u32.totalorder %s3075_s9, %s4127_s3 }
  0x25   : > { %p3078_p4 = pnand %p3077_p2, %p3076_p1 }
  0x27   : > { %p3079_p5 = pneg %p3078_p4 }
  0x29   : > { %p3084_p7 = pnand %p3082_p6, %p3079_p5 }
  0x2b   : > { %3087 = shalt.err (!%p3084_p7)
}
  0x2c   : > { %s3088_s11 = scalar_lea.vmem %s239_s23, 1024  ;;  %p3096_p8 = scmp.lt.s32.totalorder %s239_s23, %s239_s23 }
  0x2d   : > { %p3089_p9 = scmp.ne.s32.totalorder %s239_s23, %s3088_s11  ;;  %p3097_p3 = scmp.lt.s32.totalorder %s3088_s11, %s3088_s11 }
  0x2f   : > { %p3091_p11 = pnand %p3089_p9, %p3077_p2  ;;  %p3098_p12 = por %p3097_p3, %p3096_p8 }
  0x31   : > { %p3092_p13 = pneg %p3091_p11 }
  0x33   : > { %p3099_p10 = pnand %p3098_p12, %p3092_p13 }
  0x35   : > { %3102 = shalt.err (!%p3099_p10)
}
  0x36   : > { %s3204_s12 = smov 128   ;;  %s3205_s14 = smov 8  }
  0x37   : > { %2894 = dma.hbm_to_vmem [thread:$0]  (!%p3334_p0), %s4127_s3, 1024, %s239_s23, [#allocation3], %s3204_s12, %s3204_s12, %s3205_s14  }
  0x38   : > { %p4128_p1 = scmp.ne.s32.totalorder %s4124_s19, 0 }
  0x39   : > { %p4129_p4 = scmp.ne.s32.totalorder (!%p4128_p1), %s4125_s20, 0 }
  0x3a   : > { %275 = sbr.rel (%p4128_p1) target bundleno = 1040 (0x410), region = 48 }
  0x41   : > { %3164 = dma.done.wait (%p4129_p4), [#allocation3], 1024  }
  0x42   : > { %3166 = vsyncadd (%p4129_p4), [#allocation3], 4294966272  ;;  %p311_p3 = scmp.lt.s32.totalorder %s3189_s28, 1  ;;  %p313_p8 = scmp.lt.s32.totalorder %s3185_s27, 1  ;;  %v2973_v0 = vld [vmem:[%s4106_s1 + $0x40] sm:$0xff]   ;;  %v2975_v2 = vld [vmem:[%s4106_s1 + $0x48] sm:$0xff]  }
  0x43   : > { %v2974_v1 = vld [vmem:[%s4106_s1] sm:$0xff]   ;;  %2635 = vmatprep.subr.bf16.mxu0 %v2973_v0  ;;  %v2976_v3 = vld [vmem:[%s4106_s1 + $0x8] sm:$0xff]   ;;  %v2977_v4 = vld [vmem:[%s4106_s1 + $0x50] sm:$0xff]   ;;  %p783_p10 = scmp.eq.s32.totalorder %s3185_s27, 0  ;;  %vm1031_vm1 = vcmask 1040384   ;;  %s3206_s19 = smov 64  }
  0x44   : > { %s312_s11 = scalar_select %p311_p3, %s3189_s28, 1  ;;  %2636 = vmatpush3.bf16.msra.mxu0 %v2974_v1  ;;  %v2978_v5 = vld [vmem:[%s4106_s1 + $0x10] sm:$0xff]   ;;  %v2979_v6 = vld [vmem:[%s4106_s1 + $0x58] sm:$0xff]   ;;  %v2981_v8 = vld [vmem:[%s4106_s1 + $0x60] sm:$0xff]   ;;  %vm1032_vm2 = vsmask.f32 256 }
  0x45   : > { %s314_s23 = scalar_select %p313_p8, %s3185_s27, 1  ;;  %2637 = vmatprep.subr.bf16.mxu0 %v2975_v2  ;;  %v2980_v7 = vld [vmem:[%s4106_s1 + $0x18] sm:$0xff]   ;;  %v2982_v9 = vld [vmem:[%s4106_s1 + $0x20] sm:$0xff]   ;;  %v2983_v10 = vld [vmem:[%s4106_s1 + $0x68] sm:$0xff]   ;;  %vm1054_vm4 = vsmask.f32 7424 }
  0x46   : > { %s2884_s17 = smul.u32 80, %s312_s11  ;;  %v2984_v12 = vld [vmem:[%s4106_s1 + $0x28] sm:$0xff]   ;;  %v2985_v13 = vld [vmem:[%s4106_s1 + $0x70] sm:$0xff]   ;;  %v2987_v15 = vld [vmem:[%s4106_s1 + $0x78] sm:$0xff]   ;;  %vm1278_vm5 = vcmask 523264   ;;  %vm1183_vm6 = vcmask 1046528  }
  0x47   : > { %s2883_s9 = smul.u32 40, %s314_s23  ;;  %v2986_v14 = vld [vmem:[%s4106_s1 + $0x30] sm:$0xff]   ;;  %v2988_v16 = vld [vmem:[%s4106_s1 + $0x38] sm:$0xff]   ;;  %v3011_v52 = vld [vmem:[%s4107_s2 + $0x100] sm:$0xff]   ;;  %p827_p12 = scmp.eq.s32.totalorder %s3185_s27, 1 }
  0x48   : > { %2638 = vmatpush3.bf16.msra.mxu0 %v2976_v3  ;;  %v3012_v53 = vld [vmem:[%s4107_s2 + $0x108] sm:$0xff]   ;;  %v3013_v54 = vld [vmem:[%s4107_s2 + $0x110] sm:$0xff]   ;;  %v3014_v55 = vld [vmem:[%s4107_s2 + $0x118] sm:$0xff]   ;;  %s2614_s22 = sshll.u32 %s3189_s28, 6  ;;  %p4134_p2 = scmp.ne.s32.totalorder %s4121_s15, 0 }
  0x49   : > { %2639 = vmatprep.subr.bf16.mxu0 %v2977_v4  ;;  %s317_s3 = sadd.s32 %s2884_s17, %s2883_s9  ;;  %v3015_v56 = vld [vmem:[%s4107_s2 + $0x40] sm:$0xff]   ;;  %v3017_v58 = vld [vmem:[%s4107_s2 + $0x48] sm:$0xff]   ;;  %v3019_v60 = vld [vmem:[%s4107_s2 + $0x50] sm:$0xff]   ;;  %s3208_s23 = smov [#allocation5]  }
  0x4a   : > { %s2496_s14 = sshll.u32 %s317_s3, 2  ;;  %v3016_v57 = vld [vmem:[%s4107_s2] sm:$0xff]   ;;  %2711 = vmatprep.subr.bf16.mxu1 %v3015_v56  ;;  %v3018_v59 = vld [vmem:[%s4107_s2 + $0x8] sm:$0xff]   ;;  %v3020_v61 = vld [vmem:[%s4107_s2 + $0x10] sm:$0xff]   ;;  %s3107_s10 = sshll.u32 %s3208_s23, 4  ;;  %s3108_s10 = int_to_ptr.vmem [resolvable:$false] %s3107_s10 }
  0x4b   : > { %s3394_s13 = scalar_lea.vmem %s4105_s0, %s2496_s14  ;;  %2712 = vmatpush3.bf16.msra.mxu1 %v3016_v57  ;;  %v3021_v62 = vld [vmem:[%s4107_s2 + $0x58] sm:$0xff]   ;;  %v3023_v0 = vld [vmem:[%s4107_s2 + $0x60] sm:$0xff]   ;;  %v3025_v2 = vld [vmem:[%s4107_s2 + $0x68] sm:$0xff]  }
  0x4c   : > { %2640 = vmatpush3.bf16.msra.mxu0 %v2978_v5  ;;  %v2991_v11 = vld [vmem:[%s3394_s13 + $0x4] ss:$8 sps:$4 sm:$0xff]   ;;  %v324_v17 = vld [vmem:[%s3394_s13 + $0x10] sm:$0xff]  ;;  %v325_v18 = vld [vmem:[%s3394_s13 + $0x18] sm:$0xff]  ;;  %2713 = vmatprep.subr.bf16.mxu1 %v3017_v58  ;;  %s784_s3 = scalar_select %p783_p10, 1, 0 }
  0x4d   : > { %2641 = vmatprep.subr.bf16.mxu0 %v2979_v6  ;;  %641 = vmatprep.mubr.bf16.mxu0 %v2991_v11  ;;  %v2989_v19 = vld [vmem:[%s3394_s13] ss:$8 sps:$4 sm:$0xff]   ;;  %v2501_v20 = vcombine.high %v324_v17, %v325_v18  ;;  %v2500_v23 = vcombine.low %v324_v17, %v325_v18  ;;  %v328_v25 = vld [vmem:[%s3394_s13 + $0x30] sm:$0xff]  ;;  %v329_v26 = vld [vmem:[%s3394_s13 + $0x38] sm:$0xff]  ;;  %s828_s17 = scalar_select %p827_p12, 1, 0 }
  0x4e   : > { %v326_v21 = vld [vmem:[%s3394_s13 + $0x20] sm:$0xff]  ;;  %v327_v22 = vld [vmem:[%s3394_s13 + $0x28] sm:$0xff]  ;;  %v2505_v28 = vcombine.high %v328_v25, %v329_v26  ;;  %v2504_v31 = vcombine.low %v328_v25, %v329_v26  ;;  %v332_v33 = vld [vmem:[%s3394_s13 + $0x50] sm:$0xff] }
  0x4f   : > { %v2503_v24 = vcombine.high %v326_v21, %v327_v22  ;;  %v2502_v27 = vcombine.low %v326_v21, %v327_v22  ;;  %v330_v29 = vld [vmem:[%s3394_s13 + $0x40] sm:$0xff]  ;;  %v331_v30 = vld [vmem:[%s3394_s13 + $0x48] sm:$0xff]  ;;  %v333_v34 = vld [vmem:[%s3394_s13 + $0x58] sm:$0xff]  ;;  %2714 = vmatpush3.bf16.msra.mxu1 %v3018_v59 }
  0x50   : > { %2642 = vmatpush3.bf16.msra.mxu0 %v2980_v7  ;;  %v2507_v32 = vcombine.high %v330_v29, %v331_v30  ;;  %v2506_v35 = vcombine.low %v330_v29, %v331_v30  ;;  %v2509_v36 = vcombine.high %v332_v33, %v333_v34  ;;  %v334_v37 = vld [vmem:[%s3394_s13 + $0x60] sm:$0xff]  ;;  %v335_v38 = vld [vmem:[%s3394_s13 + $0x68] sm:$0xff]  ;;  %v2508_v39 = vcombine.low %v332_v33, %v333_v34  ;;  %v336_v41 = vld [vmem:[%s3394_s13 + $0x70] sm:$0xff] }
  0x51   : > { %2643 = vmatprep.subr.bf16.mxu0 %v2981_v8  ;;  %v2511_v40 = vcombine.high %v334_v37, %v335_v38  ;;  %v337_v42 = vld [vmem:[%s3394_s13 + $0x78] sm:$0xff]  ;;  %v2510_v43 = vcombine.low %v334_v37, %v335_v38  ;;  %v338_v45 = vld [vmem:[%s3394_s13 + $0x80] sm:$0xff]  ;;  %v339_v46 = vld [vmem:[%s3394_s13 + $0x88] sm:$0xff]  ;;  %2715 = vmatprep.subr.bf16.mxu1 %v3019_v60 }
  0x52   : > { %v2513_v44 = vcombine.high %v336_v41, %v337_v42  ;;  %v2512_v47 = vcombine.low %v336_v41, %v337_v42  ;;  %v2515_v48 = vcombine.high %v338_v45, %v339_v46  ;;  %v2514_v49 = vcombine.low %v338_v45, %v339_v46  ;;  %v3008_v50 = vld [vmem:[%s3394_s13 + $0x94] ss:$8 sps:$4 sm:$0xff]   ;;  %v3010_v51 = vld [vmem:[%s3394_s13 + $0x90] ss:$8 sps:$4 sm:$0xff]   ;;  %v3024_v1 = vld [vmem:[%s4107_s2 + $0x20] sm:$0xff]  }
  0x53   : > { %2716 = vmatpush3.bf16.msra.mxu1 %v3020_v61  ;;  %v3022_v63 = vld [vmem:[%s4107_s2 + $0x18] sm:$0xff]   ;;  %v3026_v3 = vld [vmem:[%s4107_s2 + $0x28] sm:$0xff]   ;;  %v3027_v4 = vld [vmem:[%s4107_s2 + $0x70] sm:$0xff]  }
  0x54   : > { %2644 = vmatpush3.bf16.msra.mxu0 %v2982_v9  ;;  %2717 = vmatprep.subr.bf16.mxu1 %v3021_v62  ;;  %v3028_v5 = vld [vmem:[%s4107_s2 + $0x30] sm:$0xff]   ;;  %v3495_v7 = vld [vmem:[%s4109_s4] ss:$0 sm:$0xff]  ;;  %v3029_v29 = vld [vmem:[%s4107_s2 + $0x78] sm:$0xff]  }
  0x55   : > { %2645 = vmatprep.subr.bf16.mxu0 %v2983_v10  ;;  %v3030_v30 = vld [vmem:[%s4107_s2 + $0x38] sm:$0xff]   ;;  %vm3507_vm3 = vmand %vm1031_vm1, %vm1032_vm2 }
  0x57   : > { %2718 = vmatpush3.bf16.msra.mxu1 %v3022_v63 }
  0x58   : > { %2646 = vmatpush3.bf16.msra.mxu0 %v2984_v12  ;;  %2719 = vmatprep.subr.bf16.mxu1 %v3023_v0 }
  0x59   : > { %2647 = vmatprep.subr.bf16.mxu0 %v2985_v13  ;;  %v785_v13 = vstv %s784_s3  ;;  %s2634_s3 = sshll.u32 %s3185_s27, 5 }
  0x5a   : > { %vm786_vm0 = vcmp.eq.s32.totalorder %v785_v13, 1  ;;  %s2388_s20 = sadd.s32 %s2634_s3, %s2614_s22 }
  0x5b   : > { %2720 = vmatpush3.bf16.msra.mxu1 %v3024_v1  ;;  %s2615_s27 = sshll.u32 %s2388_s20, 6 }
  0x5c   : > { %2648 = vmatpush3.bf16.msra.mxu0 %v2986_v14  ;;  %2721 = vmatprep.subr.bf16.mxu1 %v3025_v2  ;;  %s4045_s11 = scalar_lea.hbm %s4112_s7, %s2615_s27 }
  0x5d   : > { %2649 = vmatprep.subr.bf16.mxu0 %v2987_v15 }
  0x5f   : > { %2722 = vmatpush3.bf16.msra.mxu1 %v3026_v3 }
  0x60   : > { %2650 = vmatpush3.bf16.msra.mxu0 %v2988_v16  ;;  %2723 = vmatprep.subr.bf16.mxu1 %v3027_v4 }
  0x61   : > { %2851 = vmatprep.subr.bf16.mxu0 %v3011_v52 }
  0x63   : > { %642 = vmatmul.mubr.bf16.vlgmr.msra.gmra.mrb[0].mxu0 %v2989_v19  ;;  %2724 = vmatpush3.bf16.msra.mxu1 %v3028_v5 }
  0x64   : > { %649 = vmatprep.mubr.bf16.mxu0 %v2501_v20  ;;  %2852 = vmatpush3.bf16.msra.mxu0 %v3011_v52 }
  0x65   : > { %2853 = vmatprep.subr.bf16.mxu0 %v3012_v53  ;;  %2725 = vmatprep.subr.bf16.mxu1 %v3029_v29 }
  0x67   : > { %2726 = vmatpush3.bf16.msra.mxu1 %v3030_v30 }
  0x68   : > { %2854 = vmatpush3.bf16.msra.mxu0 %v3012_v53 }
  0x69   : > { %2855 = vmatprep.subr.bf16.mxu0 %v3013_v54 }
  0x6b   : > { %650 = vmatmul.mubr.bf16.gmra.mrb[4].mxu0 %v2500_v23 }
  0x6c   : > { %657 = vmatprep.mubr.bf16.mxu0 %v2503_v24  ;;  %2856 = vmatpush3.bf16.msra.mxu0 %v3013_v54 }
  0x6d   : > { %2857 = vmatprep.subr.bf16.mxu0 %v3014_v55 }
  0x70   : > { %2858 = vmatpush3.bf16.msra.mxu0 %v3014_v55 }
  0x73   : > { %658 = vmatmul.mubr.bf16.gmra.mrb[8].mxu0 %v2502_v27 }
  0x74   : > { %665 = vmatprep.mubr.bf16.mxu0 %v2505_v28 }
  0x7b   : > { %666 = vmatmul.mubr.bf16.gmra.mrb[12].mxu0 %v2504_v31 }
  0x7c   : > { %673 = vmatprep.mubr.bf16.mxu0 %v2507_v32 }
  0x83   : > { %674 = vmatmul.mubr.bf16.gmra.mrb[16].mxu0 %v2506_v35 }
  0x84   : > { %681 = vmatprep.mubr.bf16.mxu0 %v2509_v36 }
  0x8b   : > { %682 = vmatmul.mubr.bf16.gmra.mrb[20].mxu0 %v2508_v39 }
  0x8c   : > { %689 = vmatprep.mubr.bf16.mxu0 %v2511_v40  ;;  %v3031_v40 = vld [vmem:[%s4107_s2 + $0xc0] sm:$0xff]  }
  0x8d   : > { %2775 = vmatprep.subr.bf16.mxu1 %v3031_v40 }
  0x93   : > { %690 = vmatmul.mubr.bf16.gmra.mrb[24].mxu0 %v2510_v43 }
  0x94   : > { %697 = vmatprep.mubr.bf16.mxu0 %v2513_v44 }
  0x9b   : > { %698 = vmatmul.mubr.bf16.gmra.mrb[28].mxu0 %v2512_v47 }
  0x9c   : > { %705 = vmatprep.mubr.bf16.mxu0 %v2515_v48 }
  0xa3   : > { %706 = vmatmul.mubr.bf16.gmra.mrb[32].mxu0 %v2514_v49 }
  0xa4   : > { %713 = vmatprep.mubr.bf16.mxu0 %v3008_v50 }
  0xab   : > { %714 = vmatmul.mubr.bf16.gmra.mrb[36].mxu0 %v3010_v51 }
 0x136   : > { %v2651_v6 = vpop.f32.mrb[0].mxu0 }
 0x137   : > { %v2652_v8 = vpop.f32.mrb[1].mxu0 }
 0x138   : > { %v2653_v9 = vadd.f32 %v2652_v8, %v2651_v6  ;;  %v2654_v10 = vpop.f32.mrb[2].mxu0 }
 0x139   : > { %v2655_v11 = vpop.f32.mrb[3].mxu0 }
 0x13a   : > { %v644_v12 = vadd.f32 %v2653_v9, %v3495_v7  ;;  %v2656_v14 = vadd.f32 %v2655_v11, %v2654_v10 }
 0x13c   : > { %v722_v15 = vmax.f32 %v644_v12, 0.0  ;;  %v647_v16 = vadd.f32 %v2656_v14, %v3495_v7 }
 0x13e   : > { %v723_v17 = vmax.f32 %v647_v16, 0.0  ;;  %v2657_v18 = vpop.f32.mrb[4].mxu0  ;;  %v911_v20 = vsel %vm786_vm0, 0.0, %v722_v15 }
 0x13f   : > { %v2658_v19 = vpop.f32.mrb[5].mxu0 }
 0x140   : > { %v912_v21 = vsel %vm786_vm0, 0.0, %v723_v17  ;;  %v2659_v22 = vadd.f32 %v2658_v19, %v2657_v18  ;;  %v2660_v23 = vpop.f32.mrb[6].mxu0 }
 0x141   : > { %v931_v24 = vpack.c.bf16 %v912_v21, %v911_v20  ;;  %v2661_v25 = vpop.f32.mrb[7].mxu0 }
 0x142   : > { %v652_v26 = vadd.f32 %v2659_v22, %v3495_v7  ;;  %v2662_v27 = vadd.f32 %v2661_v25, %v2660_v23 }
 0x143   : > { %v942_v28 = vshrl.u32 %v931_v24, 16  ;;  %v945_v33 = vshll.u32 %v931_v24, 16 }
 0x144   : > { %v655_v31 = vadd.f32 %v2662_v27, %v3495_v7  ;;  %v724_v34 = vmax.f32 %v652_v26, 0.0 }
 0x145   : > { %v944_v32 = vrot.slane %v942_v28, 7 }
 0x146   : > { %v725_v35 = vmax.f32 %v655_v31, 0.0  ;;  %v2663_v36 = vpop.f32.mrb[8].mxu0 }
 0x147   : > { %v947_v37 = vor.u32 %v945_v33, %v944_v32  ;;  %v2664_v39 = vpop.f32.mrb[9].mxu0  ;;  %v3521_v49 = vsel %vm3507_vm3, %v944_v32, 0 }
 0x148   : > { %v932_v41 = vpack.c.bf16 %v725_v35, %v724_v34  ;;  %v2665_v42 = vadd.f32 %v2664_v39, %v2663_v36  ;;  %v2666_v43 = vpop.f32.mrb[10].mxu0  ;;  %v1063_v56 = vshll.u32 %v3521_v49, 16 }
 0x149   : > { %v3516_v44 = vsel %vm3507_vm3, 0, %v947_v37  ;;  %v2667_v45 = vpop.f32.mrb[11].mxu0 }
 0x14a   : > { %v949_v46 = vshrl.u32 %v932_v41, 16  ;;  %v660_v47 = vadd.f32 %v2665_v42, %v3495_v7  ;;  %v2668_v48 = vadd.f32 %v2667_v45, %v2666_v43  ;;  %v1058_v50 = vshll.u32 %v3516_v44, 16 }
 0x14b   : > { %v952_v52 = vshll.u32 %v932_v41, 16  ;;  %v1056_v54 = vshrl.u32 %v3516_v44, 16  ;;  %v1065_v5 = vrot.slane %v1063_v56, 1 }
 0x14c   : > { %v951_v51 = vrot.slane %v949_v46, 7  ;;  %v663_v53 = vadd.f32 %v2668_v48, %v3495_v7  ;;  %v1060_v55 = vrot.slane %v1058_v50, 1  ;;  %v726_v57 = vmax.f32 %v660_v47, 0.0 }
 0x14e   : > { %v727_v58 = vmax.f32 %v663_v53, 0.0  ;;  %v2669_v59 = vpop.f32.mrb[12].mxu0  ;;  %v954_v60 = vor.u32 %v952_v52, %v951_v51  ;;  %v1061_v62 = vor.u32 %v1060_v55, %v1056_v54  ;;  %v3533_v3 = vsel %vm3507_vm3, %v951_v51, 0 }
 0x14f   : > { %v2670_v61 = vpop.f32.mrb[13].mxu0  ;;  %v1075_v13 = vshll.u32 %v3533_v3, 16 }
 0x150   : > { %v933_v63 = vpack.c.bf16 %v727_v58, %v726_v57  ;;  %v2671_v0 = vadd.f32 %v2670_v61, %v2669_v59  ;;  %v2672_v1 = vpop.f32.mrb[14].mxu0  ;;  %v3529_v2 = vsel %vm3507_vm3, 0, %v954_v60  ;;  %v1066_v11 = vsel %vm1054_vm4, %v1061_v62, %v1065_v5 }
 0x151   : > { %v2673_v4 = vpop.f32.mrb[15].mxu0  ;;  %1209 = vrot.lane.b32.xlu0 %v3529_v2, %s3206_s19  ;;  %v1070_v6 = vshll.u32 %v3529_v2, 16  ;;  %v1068_v18 = vshrl.u32 %v3529_v2, 16  ;;  %v1077_v29 = vrot.slane %v1075_v13, 1 }
 0x152   : > { %v956_v8 = vshrl.u32 %v933_v63, 16  ;;  %v668_v9 = vadd.f32 %v2671_v0, %v3495_v7  ;;  %v2674_v10 = vadd.f32 %v2673_v4, %v2672_v1  ;;  %v959_v15 = vshll.u32 %v933_v63, 16 }
 0x153   : > { %v1072_v12 = vrot.slane %v1070_v6, 1 }
 0x154   : > { %v958_v14 = vrot.slane %v956_v8, 7  ;;  %v728_v16 = vmax.f32 %v668_v9, 0.0  ;;  %v671_v17 = vadd.f32 %v2674_v10, %v3495_v7 }
 0x155   : > { %1151 = vrot.lane.b32.xlu0 %v1066_v11, %s3206_s19  ;;  %v1073_v24 = vor.u32 %v1072_v12, %v1068_v18 }
 0x156   : > { %v729_v19 = vmax.f32 %v671_v17, 0.0  ;;  %v2675_v20 = vpop.f32.mrb[16].mxu0  ;;  %v961_v21 = vor.u32 %v959_v15, %v958_v14  ;;  %v1046_v22 = vsel %vm3507_vm3, %v958_v14, 0 }
 0x157   : > { %v2676_v23 = vpop.f32.mrb[17].mxu0  ;;  %v1191_v32 = vrot.slane %v1046_v22, 1  ;;  %v1087_v34 = vshll.u32 %v1046_v22, 16  ;;  %v3559_v40 = vsel %vm1054_vm4, %v1073_v24, %v1077_v29 }
 0x158   : > { %v934_v25 = vpack.c.bf16 %v729_v19, %v728_v16  ;;  %v2677_v26 = vadd.f32 %v2676_v23, %v2675_v20  ;;  %v2678_v27 = vpop.f32.mrb[18].mxu0  ;;  %v3548_v28 = vsel %vm3507_vm3, 0, %v961_v21 }
 0x159   : > { %v2679_v30 = vpop.f32.mrb[19].mxu0  ;;  %1211 = vrot.lane.b32.xlu1 %v3548_v28, %s3206_s19  ;;  %v1190_v31 = vrot.slane %v3548_v28, 1  ;;  %v1082_v33 = vshll.u32 %v3548_v28, 16  ;;  %v1080_v41 = vshrl.u32 %v3548_v28, 16  ;;  %v1089_v50 = vrot.slane %v1087_v34, 1 }
 0x15a   : > { %v963_v35 = vshrl.u32 %v934_v25, 16  ;;  %v676_v36 = vadd.f32 %v2677_v26, %v3495_v7  ;;  %v2680_v37 = vadd.f32 %v2679_v30, %v2678_v27  ;;  %v966_v45 = vshll.u32 %v934_v25, 16 }
 0x15b   : > { %v3556_v39 = vsel %vm1183_vm6, %v1190_v31, %v1191_v32  ;;  %v1084_v42 = vrot.slane %v1082_v33, 1 }
 0x15c   : > { %v965_v43 = vrot.slane %v963_v35, 7  ;;  %v730_v46 = vmax.f32 %v676_v36, 0.0  ;;  %v679_v47 = vadd.f32 %v2680_v37, %v3495_v7  ;;  %2859 = vmatprep.mubr.msk.bf16.mxu0 %vm1278_vm5, %v3556_v39 }
 0x15d   : > { %1153 = vrot.lane.b32.xlu1 %v3559_v40, %s3206_s19  ;;  %v1085_v48 = vor.u32 %v1084_v42, %v1080_v41 }
 0x15e   : > { %v1047_v51 = vsel %vm3507_vm3, %v965_v43, 0  ;;  %v731_v52 = vmax.f32 %v679_v47, 0.0  ;;  %v2681_v53 = vpop.f32.mrb[20].mxu0  ;;  %v968_v54 = vor.u32 %v966_v45, %v965_v43 }
 0x15f   : > { %v2682_v55 = vpop.f32.mrb[21].mxu0  ;;  %v3570_v56 = vsel %vm1054_vm4, %v1085_v48, %v1089_v50  ;;  %v1194_v61 = vrot.slane %v1047_v51, 1  ;;  %v1099_v1 = vshll.u32 %v1047_v51, 16 }
 0x160   : > { %v935_v57 = vpack.c.bf16 %v731_v52, %v730_v46  ;;  %v2683_v58 = vadd.f32 %v2682_v55, %v2681_v53  ;;  %v2684_v59 = vpop.f32.mrb[22].mxu0  ;;  %v3574_v60 = vsel %vm3507_vm3, 0, %v968_v54 }
 0x161   : > { %v2685_v62 = vpop.f32.mrb[23].mxu0  ;;  %1155 = vrot.lane.b32.xlu1 %v3570_v56, %s3206_s19  ;;  %v1193_v63 = vrot.slane %v3574_v60, 1  ;;  %1213 = vrot.lane.b32.xlu0 %v3574_v60, %s3206_s19  ;;  %v1094_v0 = vshll.u32 %v3574_v60, 16  ;;  %v1092_v9 = vshrl.u32 %v3574_v60, 16  ;;  %v1101_v16 = vrot.slane %v1099_v1, 1 }
 0x162   : > { %v970_v4 = vshrl.u32 %v935_v57, 16  ;;  %v684_v5 = vadd.f32 %v2683_v58, %v3495_v7  ;;  %v2686_v6 = vadd.f32 %v2685_v62, %v2684_v59  ;;  %v973_v12 = vshll.u32 %v935_v57, 16 }
 0x163   : > { %v3584_v8 = vsel %vm1183_vm6, %v1193_v63, %v1194_v61  ;;  %v1096_v10 = vrot.slane %v1094_v0, 1 }
 0x164   : > { %v972_v11 = vrot.slane %v970_v4, 7  ;;  %v732_v13 = vmax.f32 %v684_v5, 0.0  ;;  %v687_v14 = vadd.f32 %v2686_v6, %v3495_v7  ;;  %2860 = vmatmul.mubr.msk.bf16.vlgmr.msra.gmra.mrb[40].mxu0 %vm1278_vm5, %v3584_v8 }
 0x165   : > { %v1097_v15 = vor.u32 %v1096_v10, %v1092_v9 }
 0x166   : > { %v733_v17 = vmax.f32 %v687_v14, 0.0  ;;  %v2687_v18 = vpop.f32.mrb[24].mxu0  ;;  %v975_v19 = vor.u32 %v973_v12, %v972_v11  ;;  %v1048_v20 = vsel %vm3507_vm3, %v972_v11, 0 }
 0x167   : > { %v2688_v21 = vpop.f32.mrb[25].mxu0  ;;  %v3593_v22 = vsel %vm1054_vm4, %v1097_v15, %v1101_v16  ;;  %v1197_v30 = vrot.slane %v1048_v20, 1  ;;  %v1111_v32 = vshll.u32 %v1048_v20, 16 }
 0x168   : > { %v936_v23 = vpack.c.bf16 %v733_v17, %v732_v13  ;;  %v2689_v24 = vadd.f32 %v2688_v21, %v2687_v18  ;;  %v2690_v25 = vpop.f32.mrb[26].mxu0  ;;  %1157 = vrot.lane.b32.xlu1 %v3593_v22, %s3206_s19  ;;  %v3599_v26 = vsel %vm3507_vm3, 0, %v975_v19 }
 0x169   : > { %v2691_v27 = vpop.f32.mrb[27].mxu0  ;;  %1215 = vrot.lane.b32.xlu0 %v3599_v26, %s3206_s19  ;;  %v1196_v29 = vrot.slane %v3599_v26, 1  ;;  %v1106_v31 = vshll.u32 %v3599_v26, 16  ;;  %v1104_v37 = vshrl.u32 %v3599_v26, 16  ;;  %v1113_v48 = vrot.slane %v1111_v32, 1 }
 0x16a   : > { %v977_v33 = vshrl.u32 %v936_v23, 16  ;;  %v692_v34 = vadd.f32 %v2689_v24, %v3495_v7  ;;  %v2692_v35 = vadd.f32 %v2691_v27, %v2690_v25  ;;  %v980_v43 = vshll.u32 %v936_v23, 16 }
 0x16b   : > { %v3607_v36 = vsel %vm1183_vm6, %v1196_v29, %v1197_v30  ;;  %v1108_v41 = vrot.slane %v1106_v31, 1 }
 0x16c   : > { %v979_v42 = vrot.slane %v977_v33, 7  ;;  %v734_v45 = vmax.f32 %v692_v34, 0.0  ;;  %v695_v46 = vadd.f32 %v2692_v35, %v3495_v7  ;;  %2863 = vmatprep.mubr.msk.bf16.mxu0 %vm1278_vm5, %v3607_v36 }
 0x16d   : > { %v1109_v47 = vor.u32 %v1108_v41, %v1104_v37 }
 0x16e   : > { %v735_v50 = vmax.f32 %v695_v46, 0.0  ;;  %v2693_v51 = vpop.f32.mrb[28].mxu0  ;;  %v982_v52 = vor.u32 %v980_v43, %v979_v42  ;;  %v1049_v53 = vsel %vm3507_vm3, %v979_v42, 0 }
 0x16f   : > { %v2694_v54 = vpop.f32.mrb[29].mxu0  ;;  %v3616_v55 = vsel %vm1054_vm4, %v1109_v47, %v1113_v48  ;;  %v1200_v0 = vrot.slane %v1049_v53, 1  ;;  %v1123_v4 = vshll.u32 %v1049_v53, 16 }
 0x170   : > { %v937_v57 = vpack.c.bf16 %v735_v50, %v734_v45  ;;  %v2695_v58 = vadd.f32 %v2694_v54, %v2693_v51  ;;  %v2696_v59 = vpop.f32.mrb[30].mxu0  ;;  %1159 = vrot.lane.b32.xlu1 %v3616_v55, %s3206_s19  ;;  %v3622_v61 = vsel %vm3507_vm3, 0, %v982_v52 }
 0x171   : > { %v2697_v62 = vpop.f32.mrb[31].mxu0  ;;  %1217 = vrot.lane.b32.xlu0 %v3622_v61, %s3206_s19  ;;  %v1199_v63 = vrot.slane %v3622_v61, 1  ;;  %v1118_v1 = vshll.u32 %v3622_v61, 16  ;;  %v1116_v11 = vshrl.u32 %v3622_v61, 16  ;;  %v1125_v18 = vrot.slane %v1123_v4, 1 }
 0x172   : > { %v984_v5 = vshrl.u32 %v937_v57, 16  ;;  %v700_v6 = vadd.f32 %v2695_v58, %v3495_v7  ;;  %v2698_v9 = vadd.f32 %v2697_v62, %v2696_v59  ;;  %v987_v14 = vshll.u32 %v937_v57, 16 }
 0x173   : > { %v3630_v10 = vsel %vm1183_vm6, %v1199_v63, %v1200_v0  ;;  %v1120_v12 = vrot.slane %v1118_v1, 1 }
 0x174   : > { %v986_v13 = vrot.slane %v984_v5, 7  ;;  %v736_v15 = vmax.f32 %v700_v6, 0.0  ;;  %v703_v16 = vadd.f32 %v2698_v9, %v3495_v7  ;;  %2864 = vmatmul.mubr.msk.bf16.gmra.mrb[44].mxu0 %vm1278_vm5, %v3630_v10  ;;  %v829_v6 = vstv %s828_s17 }
 0x175   : > { %v1121_v17 = vor.u32 %v1120_v12, %v1116_v11  ;;  %vm3678_vm7 = vcmp.eq.s32.totalorder %v829_v6, 1 }
 0x176   : > { %v737_v19 = vmax.f32 %v703_v16, 0.0  ;;  %v2699_v20 = vpop.f32.mrb[32].mxu0  ;;  %v989_v21 = vor.u32 %v987_v14, %v986_v13  ;;  %v1050_v23 = vsel %vm3507_vm3, %v986_v13, 0 }
 0x177   : > { %v2700_v24 = vpop.f32.mrb[33].mxu0  ;;  %v3639_v25 = vsel %vm1054_vm4, %v1121_v17, %v1125_v18  ;;  %v1203_v34 = vrot.slane %v1050_v23, 1  ;;  %v1135_v37 = vshll.u32 %v1050_v23, 16 }
 0x178   : > { %v938_v27 = vpack.c.bf16 %v737_v19, %v736_v15  ;;  %v2701_v29 = vadd.f32 %v2700_v24, %v2699_v20  ;;  %v2702_v30 = vpop.f32.mrb[34].mxu0  ;;  %1161 = vrot.lane.b32.xlu1 %v3639_v25, %s3206_s19  ;;  %v3645_v31 = vsel %vm3507_vm3, 0, %v989_v21 }
 0x179   : > { %v2703_v32 = vpop.f32.mrb[35].mxu0  ;;  %1219 = vrot.lane.b32.xlu0 %v3645_v31, %s3206_s19  ;;  %v1202_v33 = vrot.slane %v3645_v31, 1  ;;  %v1130_v35 = vshll.u32 %v3645_v31, 16  ;;  %v1128_v46 = vshrl.u32 %v3645_v31, 16  ;;  %v1137_v54 = vrot.slane %v1135_v37, 1 }
 0x17a   : > { %v991_v41 = vshrl.u32 %v938_v27, 16  ;;  %v708_v42 = vadd.f32 %v2701_v29, %v3495_v7  ;;  %v2704_v43 = vadd.f32 %v2703_v32, %v2702_v30  ;;  %v994_v50 = vshll.u32 %v938_v27, 16 }
 0x17b   : > { %v3654_v45 = vsel %vm1183_vm6, %v1202_v33, %v1203_v34  ;;  %v1132_v47 = vrot.slane %v1130_v35, 1 }
 0x17c   : > { %v993_v48 = vrot.slane %v991_v41, 7  ;;  %v738_v51 = vmax.f32 %v708_v42, 0.0  ;;  %v711_v52 = vadd.f32 %v2704_v43, %v3495_v7  ;;  %2867 = vmatprep.mubr.msk.bf16.mxu0 %vm1278_vm5, %v3654_v45 }
 0x17d   : > { %v1133_v53 = vor.u32 %v1132_v47, %v1128_v46  ;;  %v1187_v46 = vrot.slane %v3529_v2, 1 }
 0x17e   : > { %v739_v57 = vmax.f32 %v711_v52, 0.0  ;;  %v996_v58 = vor.u32 %v994_v50, %v993_v48  ;;  %v2705_v59 = vpop.f32.mrb[36].mxu0  ;;  %v1051_v62 = vsel %vm3507_vm3, %v993_v48, 0 }
 0x17f   : > { %v3665_v63 = vsel %vm1054_vm4, %v1133_v53, %v1137_v54  ;;  %v2706_v0 = vpop.f32.mrb[37].mxu0  ;;  %v1206_v12 = vrot.slane %v1051_v62, 1  ;;  %v1147_v15 = vshll.u32 %v1051_v62, 16 }
 0x180   : > { %v939_v1 = vpack.c.bf16 %v739_v57, %v738_v51  ;;  %1163 = vrot.lane.b32.xlu1 %v3665_v63, %s3206_s19  ;;  %v3671_v4 = vsel %vm3507_vm3, 0, %v996_v58  ;;  %v2707_v5 = vadd.f32 %v2706_v0, %v2705_v59  ;;  %v2708_v9 = vpop.f32.mrb[38].mxu0  ;;  %v1188_v51 = vrot.slane %v3533_v3, 1 }
 0x181   : > { %1221 = vrot.lane.b32.xlu0 %v3671_v4, %s3206_s19  ;;  %v1205_v11 = vrot.slane %v3671_v4, 1  ;;  %v2709_v13 = vpop.f32.mrb[39].mxu0  ;;  %v1142_v14 = vshll.u32 %v3671_v4, 16  ;;  %v1140_v21 = vshrl.u32 %v3671_v4, 16  ;;  %v1149_v33 = vrot.slane %v1147_v15, 1 }
 0x182   : > { %v998_v16 = vshrl.u32 %v939_v1, 16  ;;  %v716_v17 = vadd.f32 %v2707_v5, %v3495_v7  ;;  %v2710_v18 = vadd.f32 %v2709_v13, %v2708_v9  ;;  %v1001_v27 = vshll.u32 %v939_v1, 16 }
 0x183   : > { %v3683_v20 = vsel %vm1183_vm6, %v1205_v11, %v1206_v12  ;;  %v1144_v23 = vrot.slane %v1142_v14, 1  ;;  %v1189_v57 = vsel %vm1183_vm6, %v1187_v46, %v1188_v51  ;;  %v3038_v51 = vld [vmem:[%s4107_s2 + $0x98] sm:$0xff]  }
 0x184   : > { %v1000_v24 = vrot.slane %v998_v16, 7  ;;  %v740_v29 = vmax.f32 %v716_v17, 0.0  ;;  %2868 = vmatmul.mubr.msk.bf16.gmra.mrb[48].mxu0 %vm1278_vm5, %v3683_v20  ;;  %v719_v30 = vadd.f32 %v2710_v18, %v3495_v7 }
 0x185   : > { %v1145_v32 = vor.u32 %v1144_v23, %v1140_v21 }
 0x186   : > { %v929_v34 = vsel %vm3678_vm7, 0.0, %v740_v29  ;;  %v741_v35 = vmax.f32 %v719_v30, 0.0  ;;  %v1003_v37 = vor.u32 %v1001_v27, %v1000_v24  ;;  %v1052_v41 = vsel %vm3507_vm3, %v1000_v24, 0 }
 0x187   : > { %v3694_v42 = vsel %vm1054_vm4, %v1145_v32, %v1149_v33  ;;  %v1239_v50 = vrot.slane %v1052_v41, 1  ;;  %v1233_v9 = vshll.u32 %v1052_v41, 16  ;;  %v1184_v24 = vrot.slane %v3516_v44, 1  ;;  %v3032_v33 = vld [vmem:[%s4107_s2 + $0x80] sm:$0xff]  }
 0x188   : > { %v930_v43 = vsel %vm3678_vm7, 0.0, %v741_v35  ;;  %1165 = vrot.lane.b32.xlu1 %v3694_v42, %s3206_s19  ;;  %v3702_v7 = vsel %vm3507_vm3, 0, %v1003_v37  ;;  %v1185_v27 = vrot.slane %v3521_v49, 1  ;;  %v3033_v35 = vld [vmem:[%s4107_s2 + $0xc8] sm:$0xff]  }
 0x189   : > { %v940_v47 = vpack.c.bf16 %v930_v43, %v929_v34  ;;  %1223 = vrot.lane.b32.xlu0 %v3702_v7, %s3206_s19  ;;  %v1238_v48 = vrot.slane %v3702_v7, 1  ;;  %v1228_v58 = vshll.u32 %v3702_v7, 16  ;;  %v1226_v6 = vshrl.u32 %v3702_v7, 16  ;;  %v3034_v49 = vld [vmem:[%s4107_s2 + $0x88] sm:$0xff]   ;;  %v3035_v43 = vld [vmem:[%s4107_s2 + $0xd0] sm:$0xff]  }
 0x18a   : > { %v1235_v17 = vrot.slane %v1233_v9, 1  ;;  %v1186_v30 = vsel %vm1183_vm6, %v1184_v24, %v1185_v27 }
 0x18b   : > { %v1005_v52 = vshrl.u32 %v940_v47, 16  ;;  %v1008_v53 = vshll.u32 %v940_v47, 16  ;;  %v1240_v54 = vsel %vm1183_vm6, %v1238_v48, %v1239_v50  ;;  %v1230_v0 = vrot.slane %v1228_v58, 1  ;;  %v3037_v48 = vld [vmem:[%s4107_s2 + $0xd8] sm:$0xff]   ;;  %v3041_v58 = vld [vmem:[%s4107_s2 + $0xe8] sm:$0xff]  }
 0x18c   : > { %2871 = vmatprep.mubr.msk.bf16.mxu0 %vm1278_vm5, %v1240_v54  ;;  %1243 = vrot.lane.b32.xlu1 %v3556_v39, %s3206_s19 }
 0x18d   : > { %v1007_v59 = vrot.slane %v1005_v52, 7  ;;  %1241 = vrot.lane.b32.xlu0 %v1189_v57, %s3206_s19  ;;  %v1231_v15 = vor.u32 %v1230_v0, %v1226_v6  ;;  %v3045_v6 = vld [vmem:[%s4107_s2 + $0xf8] sm:$0xff]  }
 0x18f   : > { %v1010_v62 = vor.u32 %v1008_v53, %v1007_v59  ;;  %v1053_v3 = vsel %vm3507_vm3, %v1007_v59, 0  ;;  %v3739_v21 = vsel %vm1054_vm4, %v1231_v15, %v1235_v17  ;;  %v3039_v53 = vld [vmem:[%s4107_s2 + $0xe0] sm:$0xff]  }
 0x190   : > { %1247 = vrot.lane.b32.xlu1 %v3607_v36, %s3206_s19  ;;  %v1276_v1 = vrot.slane %v1053_v3, 1  ;;  %v1265_v13 = vshll.u32 %v1053_v3, 16  ;;  %v3043_v3 = vld [vmem:[%s4107_s2 + $0xf0] sm:$0xff]  }
 0x191   : > { %v3722_v5 = vsel %vm3507_vm3, 0, %v1010_v62  ;;  %1245 = vrot.lane.b32.xlu0 %v3584_v8, %s3206_s19 }
 0x192   : > { %v1258_v11 = vshrl.u32 %v3722_v5, 16  ;;  %v1260_v12 = vshll.u32 %v3722_v5, 16  ;;  %v1275_v14 = vrot.slane %v3722_v5, 1  ;;  %v1267_v19 = vrot.slane %v1265_v13, 1 }
 0x194   : > { %1251 = vrot.lane.b32.xlu1 %v3654_v45, %s3206_s19  ;;  %v1262_v38 = vrot.slane %v1260_v12, 1  ;;  %v1277_v16 = vsel %vm1183_vm6, %v1275_v14, %v1276_v1 }
 0x195   : > { %1249 = vrot.lane.b32.xlu0 %v3630_v10, %s3206_s19  ;;  %2872 = vmatmul.mubr.msk.bf16.gmra.mrb[52].mxu0 %vm1278_vm5, %v1277_v16 }
 0x196   : > { %v1263_v18 = vor.u32 %v1262_v38, %v1258_v11 }
 0x198   : > { %1253 = vrot.lane.b32.xlu1 %v3683_v20, %s3206_s19  ;;  %v1268_v23 = vsel %vm1054_vm4, %v1263_v18, %v1267_v19 }
 0x199   : > { %1269 = vrot.lane.b32.xlu0 %v3739_v21, %s3206_s19 }
 0x19c   : > { %1255 = vrot.lane.b32.xlu1 %v1240_v54, %s3206_s19 }
 0x19d   : > { %1271 = vrot.lane.b32.xlu0 %v1268_v23, %s3206_s19  ;;  %s308_s19 = sand.u32 1, %s3177_s25  }
 0x19e   : > { %s2495_s17 = sshll.u32 %s308_s19, 7  ;;  %s4053_s14 = scalar_lea.sflag [#allocation4], %s308_s19 }
 0x19f   : > { %s3984_s9 = scalar_lea.vmem [#allocation5], %s2495_s17  ;;  %s3109_s17 = scalar_lea.vmem %s3108_s10, 4096 }
 0x1a0   : > { %s2391_s28 = sshll.u32 %s3984_s9, 4  ;;  %s4047_s28 = int_to_ptr.vmem [resolvable:$true] %s2391_s28 }
 0x1a1   : > { %s3103_s18 = scalar_lea.vmem %s4047_s28, 2048  ;;  %p3110_p7 = scmp.lt.s32.totalorder %s4047_s28, %s3108_s10 }
 0x1a2   : > { %p3104_p0 = scmp.ne.s32.totalorder %s4047_s28, %s3103_s18  ;;  %p3111_p9 = scmp.lt.s32.totalorder %s3109_s17, %s3103_s18 }
 0x1a4   : > { %p3105_p5 = pnand %p3104_p0, %p4134_p2  ;;  %p3112_p11 = por %p3111_p9, %p3110_p7 }
 0x1a6   : > { %p3106_p6 = pneg %p3105_p5 }
 0x1a8   : > { %p3113_p13 = pnand %p3112_p11, %p3106_p6 }
 0x1c3   : > { %v1210_v29 = vpop.permute.xlu0 %1209 }
 0x1c4   : > { %v1305_v32 = vsel %vm1278_vm5, %v1186_v30, %v1210_v29 }
 0x1c5   : > { %1718 = vmatprep.mubr.bf16.mxu1 %v1305_v32 }
 0x1c7   : > { %v1152_v34 = vpop.permute.xlu0 %1151 }
 0x1c8   : > { %v1280_v37 = vsel %vm1278_vm5, %v3516_v44, %v1152_v34  ;;  %v3036_v44 = vld [vmem:[%s4107_s2 + $0x90] sm:$0xff]  }
 0x1c9   : > { %1719 = vmatmul.mubr.bf16.vlgmr.msra.gmra.mrb[0].mxu1 %v1280_v37 }
 0x1ca   : > { %2776 = vmatpush3.bf16.msra.mxu1 %v3032_v33 }
 0x1cb   : > { %v1212_v41 = vpop.permute.xlu1 %1211  ;;  %2777 = vmatprep.subr.bf16.mxu1 %v3033_v35 }
 0x1cc   : > { %v1309_v46 = vsel %vm1278_vm5, %v1189_v57, %v1212_v41 }
 0x1cd   : > { %1726 = vmatprep.mubr.bf16.mxu1 %v1309_v46 }
 0x1ce   : > { %2778 = vmatpush3.bf16.msra.mxu1 %v3034_v49 }
 0x1cf   : > { %v1154_v47 = vpop.permute.xlu1 %1153  ;;  %2779 = vmatprep.subr.bf16.mxu1 %v3035_v43 }
 0x1d0   : > { %v1283_v50 = vsel %vm1278_vm5, %v3529_v2, %v1154_v47  ;;  %v3040_v2 = vld [vmem:[%s4107_s2 + $0xa0] sm:$0xff]  }
 0x1d1   : > { %1727 = vmatmul.mubr.bf16.gmra.mrb[4].mxu1 %v1283_v50  ;;  %v3047_v50 = vld [vmem:[#allocation2] ss:$8 sps:$4 sm:$0xff]  }
 0x1d2   : > { %2780 = vmatpush3.bf16.msra.mxu1 %v3036_v44 }
 0x1d3   : > { %v1214_v52 = vpop.permute.xlu0 %1213  ;;  %2781 = vmatprep.subr.bf16.mxu1 %v3037_v48  ;;  %v1156_v57 = vpop.permute.xlu1 %1155 }
 0x1d4   : > { %v1313_v54 = vsel %vm1278_vm5, %v3556_v39, %v1214_v52  ;;  %v1286_v59 = vsel %vm1278_vm5, %v3548_v28, %v1156_v57  ;;  %v3042_v39 = vld [vmem:[%s4107_s2 + $0xa8] sm:$0xff]   ;;  %v3044_v28 = vld [vmem:[%s4107_s2 + $0xb0] sm:$0xff]  }
 0x1d5   : > { %1734 = vmatprep.mubr.bf16.mxu1 %v1313_v54  ;;  %v3052_v54 = vld [vmem:[#allocation2 + $0x14] ss:$8 sps:$4 sm:$0xff]   ;;  %v3050_v57 = vld [vmem:[#allocation2 + $0x10] ss:$8 sps:$4 sm:$0xff]  }
 0x1d6   : > { %2782 = vmatpush3.bf16.msra.mxu1 %v3038_v51  ;;  %v3049_v51 = vld [vmem:[#allocation2 + $0x4] ss:$8 sps:$4 sm:$0xff]  }
 0x1d7   : > { %2783 = vmatprep.subr.bf16.mxu1 %v3039_v53  ;;  %2085 = vmatprep.subr.bf16.mxu0 %v3049_v51 }
 0x1d8   : > { %2086 = vmatpush1.bf16.msra.mxu0 %v3047_v50 }
 0x1d9   : > { %1735 = vmatmul.mubr.bf16.gmra.mrb[8].mxu1 %v1286_v59  ;;  %2087 = vmatprep.subr.bf16.mxu0 %v3052_v54 }
 0x1da   : > { %2784 = vmatpush3.bf16.msra.mxu1 %v3040_v2  ;;  %v1158_v1 = vpop.permute.xlu1 %1157  ;;  %v3055_v2 = vld [vmem:[#allocation2 + $0x24] ss:$8 sps:$4 sm:$0xff]  }
 0x1db   : > { %v1216_v62 = vpop.permute.xlu0 %1215  ;;  %2785 = vmatprep.subr.bf16.mxu1 %v3041_v58  ;;  %v1289_v9 = vsel %vm1278_vm5, %v3574_v60, %v1158_v1  ;;  %v3053_v58 = vld [vmem:[#allocation2 + $0x20] ss:$8 sps:$4 sm:$0xff]  }
 0x1dc   : > { %v1317_v0 = vsel %vm1278_vm5, %v3584_v8, %v1216_v62  ;;  %v3046_v8 = vld [vmem:[%s4107_s2 + $0xb8] sm:$0xff]   ;;  %2088 = vmatpush1.bf16.msra.mxu0 %v3050_v57 }
 0x1dd   : > { %1742 = vmatprep.mubr.bf16.mxu1 %v1317_v0  ;;  %2089 = vmatprep.subr.bf16.mxu0 %v3055_v2 }
 0x1de   : > { %2786 = vmatpush3.bf16.msra.mxu1 %v3042_v39  ;;  %v3056_v39 = vld [vmem:[#allocation2 + $0x30] ss:$8 sps:$4 sm:$0xff]  }
 0x1df   : > { %2787 = vmatprep.subr.bf16.mxu1 %v3043_v3 }
 0x1e0   : > { %2090 = vmatpush1.bf16.msra.mxu0 %v3053_v58 }
 0x1e1   : > { %1743 = vmatmul.mubr.bf16.gmra.mrb[12].mxu1 %v1289_v9 }
 0x1e2   : > { %2788 = vmatpush3.bf16.msra.mxu1 %v3044_v28  ;;  %v1160_v13 = vpop.permute.xlu1 %1159  ;;  %v3207_v28 = vmov 0  }
 0x1e3   : > { %v1218_v11 = vpop.permute.xlu0 %1217  ;;  %2789 = vmatprep.subr.bf16.mxu1 %v3045_v6  ;;  %v1292_v14 = vsel %vm1278_vm5, %v3599_v26, %v1160_v13  ;;  %2117 = vmatprep.mubr.bf16.mxu0 %v3207_v28 }
 0x1e4   : > { %v1321_v12 = vsel %vm1278_vm5, %v3607_v36, %v1218_v11 }
 0x1e5   : > { %1750 = vmatprep.mubr.bf16.mxu1 %v1321_v12 }
 0x1e6   : > { %2790 = vmatpush3.bf16.msra.mxu1 %v3046_v8 }
 0x1e7   : > { %2875 = vmatprep.subr.bf16.mxu1 %v3049_v51 }
 0x1e9   : > { %1751 = vmatmul.mubr.bf16.gmra.mrb[16].mxu1 %v1292_v14 }
 0x1ea   : > { %v1162_v38 = vpop.permute.xlu1 %1161 }
 0x1eb   : > { %v1220_v15 = vpop.permute.xlu0 %1219  ;;  %v1295_v16 = vsel %vm1278_vm5, %v3622_v61, %v1162_v38 }
 0x1ec   : > { %v1325_v60 = vsel %vm1278_vm5, %v3630_v10, %v1220_v15 }
 0x1ed   : > { %1758 = vmatprep.mubr.bf16.mxu1 %v1325_v60 }
 0x1f1   : > { %1759 = vmatmul.mubr.bf16.gmra.mrb[20].mxu1 %v1295_v16 }
 0x1f2   : > { %v1164_v18 = vpop.permute.xlu1 %1163 }
 0x1f3   : > { %v1222_v17 = vpop.permute.xlu0 %1221  ;;  %v1298_v26 = vsel %vm1278_vm5, %v3645_v31, %v1164_v18 }
 0x1f4   : > { %v1329_v36 = vsel %vm1278_vm5, %v3654_v45, %v1222_v17 }
 0x1f5   : > { %1766 = vmatprep.mubr.bf16.mxu1 %v1329_v36 }
 0x1f9   : > { %1767 = vmatmul.mubr.bf16.gmra.mrb[24].mxu1 %v1298_v26 }
 0x1fa   : > { %v1166_v23 = vpop.permute.xlu1 %1165 }
 0x1fb   : > { %v1224_v19 = vpop.permute.xlu0 %1223  ;;  %v1301_v61 = vsel %vm1278_vm5, %v3671_v4, %v1166_v23 }
 0x1fc   : > { %v1333_v10 = vsel %vm1278_vm5, %v3683_v20, %v1224_v19 }
 0x1fd   : > { %1774 = vmatprep.mubr.bf16.mxu1 %v1333_v10 }
 0x1fe   : > { %v1244_v27 = vpop.permute.xlu1 %1243 }
 0x1ff   : > { %v1242_v24 = vpop.permute.xlu0 %1241  ;;  %v1341_v31 = vsel %vm1278_vm5, %v3570_v56, %v1244_v27 }
 0x200   : > { %v1337_v45 = vsel %vm1278_vm5, %v3559_v40, %v1242_v24 }
 0x201   : > { %1775 = vmatmul.mubr.bf16.gmra.mrb[28].mxu1 %v1301_v61 }
 0x202   : > { %1815 = vmatprep.mubr.bf16.mxu1 %v1286_v59  ;;  %v1248_v4 = vpop.permute.xlu1 %1247  ;;  %v3058_v59 = vld [vmem:[#allocation2 + $0x34] ss:$8 sps:$4 sm:$0xff]  }
 0x203   : > { %v1246_v20 = vpop.permute.xlu0 %1245  ;;  %v1349_v30 = vsel %vm1278_vm5, %v3616_v55, %v1248_v4  ;;  %2091 = vmatprep.subr.bf16.mxu0 %v3058_v59 }
 0x204   : > { %v1345_v29 = vsel %vm1278_vm5, %v3593_v22, %v1246_v20  ;;  %2092 = vmatpush1.bf16.msra.mxu0 %v3056_v39 }
 0x206   : > { %v1252_v56 = vpop.permute.xlu1 %1251 }
 0x207   : > { %v1250_v40 = vpop.permute.xlu0 %1249  ;;  %v1357_v34 = vsel %vm1278_vm5, %v3665_v63, %v1252_v56 }
 0x208   : > { %v1353_v32 = vsel %vm1278_vm5, %v3639_v25, %v1250_v40 }
 0x209   : > { %1816 = vmatmul.mubr.bf16.vlgmr.msra.gmra.mrb[32].mxu1 %v1337_v45 }
 0x20a   : > { %1823 = vmatprep.mubr.bf16.mxu1 %v1289_v9  ;;  %v1254_v35 = vpop.permute.xlu1 %1253  ;;  %2879 = vmatpush1.bf16.msra.mxu1 %v3047_v50 }
 0x20b   : > { %v1270_v33 = vpop.permute.xlu0 %1269  ;;  %v1361_v25 = vsel %vm1278_vm5, %v3694_v42, %v1254_v35  ;;  %2876 = vmatprep.subr.bf16.mxu1 %v3052_v54 }
 0x20c   : > { %v1368_v22 = vsel %vm1278_vm5, %v3702_v7, %v1270_v33 }
 0x20e   : > { %v1256_v7 = vpop.permute.xlu1 %1255  ;;  %2880 = vmatpush1.bf16.msra.mxu1 %v3050_v57 }
 0x20f   : > { %v1272_v55 = vpop.permute.xlu0 %1271  ;;  %v1365_v46 = vsel %vm1278_vm5, %v3739_v21, %v1256_v7  ;;  %2877 = vmatprep.subr.bf16.mxu1 %v3055_v2 }
 0x210   : > { %v1371_v63 = vsel %vm1278_vm5, %v3722_v5, %v1272_v55 }
 0x211   : > { %1824 = vmatmul.mubr.bf16.gmra.mrb[36].mxu1 %v1341_v31 }
 0x212   : > { %1831 = vmatprep.mubr.bf16.mxu1 %v1292_v14  ;;  %2881 = vmatpush1.bf16.msra.mxu1 %v3053_v58 }
 0x213   : > { %2878 = vmatprep.subr.bf16.mxu1 %v3058_v59 }
 0x216   : > { %2882 = vmatpush1.bf16.msra.mxu1 %v3056_v39 }
 0x219   : > { %1832 = vmatmul.mubr.bf16.gmra.mrb[40].mxu1 %v1345_v29 }
 0x21a   : > { %1839 = vmatprep.mubr.bf16.mxu1 %v1295_v16 }
 0x221   : > { %1840 = vmatmul.mubr.bf16.gmra.mrb[44].mxu1 %v1349_v30 }
 0x222   : > { %1847 = vmatprep.mubr.bf16.mxu1 %v1298_v26 }
 0x229   : > { %1848 = vmatmul.mubr.bf16.gmra.mrb[48].mxu1 %v1353_v32 }
 0x22a   : > { %1855 = vmatprep.mubr.bf16.mxu1 %v1301_v61 }
 0x231   : > { %1856 = vmatmul.mubr.bf16.gmra.mrb[52].mxu1 %v1357_v34 }
 0x232   : > { %1863 = vmatprep.mubr.bf16.mxu1 %v1368_v22 }
 0x237   : > { %v3838_v37 = vpop.f32.mrb[40].mxu0 }
 0x238   : > { %v3840_v49 = vpop.f32.mrb[41].mxu0 }
 0x239   : > { %1864 = vmatmul.mubr.bf16.gmra.mrb[56].mxu1 %v1361_v25  ;;  %v3844_v41 = vpop.f32.mrb[42].mxu0 }
 0x23a   : > { %1871 = vmatprep.mubr.bf16.mxu1 %v1371_v63  ;;  %v3848_v43 = vpop.f32.mrb[43].mxu0 }
 0x241   : > { %1872 = vmatmul.mubr.bf16.gmra.mrb[60].mxu1 %v1365_v46 }
 0x242   : > { %2167 = vmatprep.mubr.bf16.mxu1 %v3207_v28 }
 0x247   : > { %v3852_v44 = vpop.f32.mrb[44].mxu0 }
 0x248   : > { %v3854_v47 = vpop.f32.mrb[45].mxu0 }
 0x249   : > { %v3856_v48 = vpop.f32.mrb[46].mxu0 }
 0x24a   : > { %v3858_v42 = vpop.f32.mrb[47].mxu0 }
 0x257   : > { %v3860_v5 = vpop.f32.mrb[48].mxu0 }
 0x258   : > { %v3862_v52 = vpop.f32.mrb[49].mxu0 }
 0x259   : > { %v3864_v21 = vpop.f32.mrb[50].mxu0 }
 0x25a   : > { %v3866_v53 = vpop.f32.mrb[51].mxu0 }
 0x268   : > { %v3868_v62 = vpop.f32.mrb[52].mxu0 }
 0x269   : > { %v3870_v3 = vpop.f32.mrb[53].mxu0 }
 0x26a   : > { %v3872_v0 = vpop.f32.mrb[54].mxu0 }
 0x26b   : > { %v3874_v1 = vpop.f32.mrb[55].mxu0 }
 0x29c   : > { %v2727_v6 = vpop.f32.mrb[0].mxu1 }
 0x29d   : > { %v2728_v9 = vpop.f32.mrb[1].mxu1 }
 0x29e   : > { %v2729_v8 = vadd.f32 %v2728_v9, %v2727_v6  ;;  %v2730_v11 = vpop.f32.mrb[2].mxu1  ;;  %v3905_v9 = vld [vmem:[%s4110_s5] ss:$0 sm:$0xff] }
 0x29f   : > { %v2731_v12 = vpop.f32.mrb[3].mxu1 }
 0x2a0   : > { %v2732_v13 = vadd.f32 %v2731_v12, %v2730_v11 }
 0x2a4   : > { %v2733_v14 = vpop.f32.mrb[4].mxu1 }
 0x2a5   : > { %v2734_v15 = vpop.f32.mrb[5].mxu1 }
 0x2a6   : > { %v2735_v60 = vadd.f32 %v2734_v15, %v2733_v14  ;;  %v2736_v38 = vpop.f32.mrb[6].mxu1  ;;  %v1721_v14 = vadd.f32 %v2729_v8, %v3905_v9 }
 0x2a7   : > { %v2737_v16 = vpop.f32.mrb[7].mxu1 }
 0x2a8   : > { %v2738_v17 = vadd.f32 %v2737_v16, %v2736_v38 }
 0x2ac   : > { %v2739_v36 = vpop.f32.mrb[8].mxu1 }
 0x2ad   : > { %v2740_v18 = vpop.f32.mrb[9].mxu1 }
 0x2ae   : > { %v3878_v26 = vadd.f32 %v2740_v18, %v2739_v36  ;;  %v2742_v19 = vpop.f32.mrb[10].mxu1  ;;  %v1724_v36 = vadd.f32 %v2732_v13, %v3905_v9 }
 0x2af   : > { %v2743_v10 = vpop.f32.mrb[11].mxu1 }
 0x2b0   : > { %v3880_v23 = vadd.f32 %v2743_v10, %v2742_v19 }
 0x2b4   : > { %v2745_v61 = vpop.f32.mrb[12].mxu1 }
 0x2b5   : > { %v2746_v24 = vpop.f32.mrb[13].mxu1 }
 0x2b6   : > { %v3882_v45 = vadd.f32 %v2746_v24, %v2745_v61  ;;  %v2748_v27 = vpop.f32.mrb[14].mxu1 }
 0x2b7   : > { %v2749_v31 = vpop.f32.mrb[15].mxu1 }
 0x2b8   : > { %v3884_v20 = vadd.f32 %v2749_v31, %v2748_v27 }
 0x2bc   : > { %v2751_v29 = vpop.f32.mrb[16].mxu1 }
 0x2bd   : > { %v2752_v4 = vpop.f32.mrb[17].mxu1 }
 0x2be   : > { %v3886_v30 = vadd.f32 %v2752_v4, %v2751_v29  ;;  %v2754_v40 = vpop.f32.mrb[18].mxu1  ;;  %v1729_v29 = vadd.f32 %v2735_v60, %v3905_v9 }
 0x2bf   : > { %v2755_v32 = vpop.f32.mrb[19].mxu1 }
 0x2c0   : > { %v3888_v56 = vadd.f32 %v2755_v32, %v2754_v40 }
 0x2c4   : > { %v2757_v33 = vpop.f32.mrb[20].mxu1 }
 0x2c5   : > { %v2758_v34 = vpop.f32.mrb[21].mxu1 }
 0x2c6   : > { %v3890_v22 = vadd.f32 %v2758_v34, %v2757_v33  ;;  %v2760_v35 = vpop.f32.mrb[22].mxu1  ;;  %v1732_v34 = vadd.f32 %v2738_v17, %v3905_v9 }
 0x2c7   : > { %v2761_v55 = vpop.f32.mrb[23].mxu1 }
 0x2c8   : > { %v3892_v25 = vadd.f32 %v2761_v55, %v2760_v35 }
 0x2cc   : > { %v2763_v63 = vpop.f32.mrb[24].mxu1 }
 0x2cd   : > { %v2764_v7 = vpop.f32.mrb[25].mxu1 }
 0x2ce   : > { %v3894_v46 = vadd.f32 %v2764_v7, %v2763_v63  ;;  %v2766_v50 = vpop.f32.mrb[26].mxu1 }
 0x2cf   : > { %v2767_v51 = vpop.f32.mrb[27].mxu1 }
 0x2d0   : > { %v3896_v54 = vadd.f32 %v2767_v51, %v2766_v50  ;;  %v1737_v50 = vadd.f32 %v3878_v26, %v3905_v9 }
 0x2d4   : > { %v2769_v57 = vpop.f32.mrb[28].mxu1 }
 0x2d5   : > { %v2770_v2 = vpop.f32.mrb[29].mxu1 }
 0x2d6   : > { %v3898_v58 = vadd.f32 %v2770_v2, %v2769_v57  ;;  %v2772_v59 = vpop.f32.mrb[30].mxu1 }
 0x2d7   : > { %v2773_v39 = vpop.f32.mrb[31].mxu1 }
 0x2d8   : > { %v3900_v6 = vadd.f32 %v2773_v39, %v2772_v59 }
 0x2dc   : > { %v2791_v11 = vpop.f32.mrb[32].mxu1 }
 0x2dd   : > { %v2792_v12 = vpop.f32.mrb[33].mxu1 }
 0x2de   : > { %v2793_v15 = vadd.f32 %v2792_v12, %v2791_v11  ;;  %v2794_v38 = vpop.f32.mrb[34].mxu1 }
 0x2df   : > { %v2795_v16 = vpop.f32.mrb[35].mxu1 }
 0x2e0   : > { %v1818_v18 = vadd.f32 %v2793_v15, %v1721_v14  ;;  %v2796_v19 = vadd.f32 %v2795_v16, %v2794_v38  ;;  %v1745_v16 = vadd.f32 %v3882_v45, %v3905_v9 }
 0x2e2   : > { %v1915_v10 = vadd.f32 %v3840_v49, %v1818_v18  ;;  %v1821_v61 = vadd.f32 %v2796_v19, %v1724_v36 }
 0x2e4   : > { %v1918_v24 = vadd.f32 %v3848_v43, %v1821_v61  ;;  %v2797_v27 = vpop.f32.mrb[36].mxu1  ;;  %v1977_v4 = vmax.f32 %v1915_v10, 0.0 }
 0x2e5   : > { %v2798_v31 = vpop.f32.mrb[37].mxu1 }
 0x2e6   : > { %v1978_v40 = vmax.f32 %v1918_v24, 0.0  ;;  %v2799_v32 = vadd.f32 %v2798_v31, %v2797_v27  ;;  %v2800_v8 = vpop.f32.mrb[38].mxu1 }
 0x2e7   : > { %v2801_v33 = vpop.f32.mrb[39].mxu1 }
 0x2e8   : > { %v1993_v35 = vpack.c.bf16 %v1978_v40, %v1977_v4  ;;  %v1826_v13 = vadd.f32 %v2799_v32, %v1729_v29  ;;  %v2802_v55 = vadd.f32 %v2801_v33, %v2800_v8  ;;  %v1753_v40 = vadd.f32 %v3886_v30, %v3905_v9 }
 0x2ea   : > { %v1923_v63 = vadd.f32 %v3838_v37, %v1826_v13  ;;  %v1829_v49 = vadd.f32 %v2802_v55, %v1732_v34  ;;  %2587 = vmatmul.mubr.msk.bf16.vlgmr.msra.gmra.mrb[56].mxu0 %vm1278_vm5, %v1993_v35  ;;  %v1740_v37 = vadd.f32 %v3880_v23, %v3905_v9 }
 0x2eb   : > { %2127 = vmatprep.mubr.bf16.mxu0 %v3207_v28 }
 0x2ec   : > { %v1926_v43 = vadd.f32 %v3844_v41, %v1829_v49  ;;  %v2803_v60 = vpop.f32.mrb[40].mxu1  ;;  %v1979_v51 = vmax.f32 %v1923_v63, 0.0 }
 0x2ed   : > { %v2804_v7 = vpop.f32.mrb[41].mxu1 }
 0x2ee   : > { %v1980_v57 = vmax.f32 %v1926_v43, 0.0  ;;  %v2805_v17 = vadd.f32 %v2804_v7, %v2803_v60  ;;  %v2806_v2 = vpop.f32.mrb[42].mxu1  ;;  %v1761_v60 = vadd.f32 %v3890_v22, %v3905_v9 }
 0x2ef   : > { %v2807_v59 = vpop.f32.mrb[43].mxu1 }
 0x2f0   : > { %v1994_v39 = vpack.c.bf16 %v1980_v57, %v1979_v51  ;;  %v1834_v11 = vadd.f32 %v2805_v17, %v1737_v50  ;;  %v2808_v12 = vadd.f32 %v2807_v59, %v2806_v2 }
 0x2f2   : > { %v1931_v14 = vadd.f32 %v3854_v47, %v1834_v11  ;;  %v1837_v15 = vadd.f32 %v2808_v12, %v1740_v37  ;;  %2588 = vmatmul.mubr.msk.bf16.gmra.mrb[60].mxu0 %vm1278_vm5, %v1994_v39  ;;  %v1748_v47 = vadd.f32 %v3884_v20, %v3905_v9  ;;  %v1769_v12 = vadd.f32 %v3894_v46, %v3905_v9 }
 0x2f3   : > { %2137 = vmatprep.mubr.bf16.mxu0 %v3207_v28 }
 0x2f4   : > { %v1934_v41 = vadd.f32 %v3858_v42, %v1837_v15  ;;  %v2809_v26 = vpop.f32.mrb[44].mxu1  ;;  %v1981_v36 = vmax.f32 %v1931_v14, 0.0 }
 0x2f5   : > { %v2810_v38 = vpop.f32.mrb[45].mxu1 }
 0x2f6   : > { %v1982_v18 = vmax.f32 %v1934_v41, 0.0  ;;  %v2811_v23 = vadd.f32 %v2810_v38, %v2809_v26  ;;  %v2812_v19 = vpop.f32.mrb[46].mxu1  ;;  %v1772_v38 = vadd.f32 %v3896_v54, %v3905_v9 }
 0x2f7   : > { %v2813_v10 = vpop.f32.mrb[47].mxu1 }
 0x2f8   : > { %v1995_v61 = vpack.c.bf16 %v1982_v18, %v1981_v36  ;;  %v1842_v24 = vadd.f32 %v2811_v23, %v1745_v16  ;;  %v2814_v27 = vadd.f32 %v2813_v10, %v2812_v19  ;;  %v1777_v10 = vadd.f32 %v3898_v58, %v3905_v9 }
 0x2fa   : > { %v1939_v31 = vadd.f32 %v3852_v44, %v1842_v24  ;;  %v1845_v29 = vadd.f32 %v2814_v27, %v1748_v47  ;;  %2589 = vmatmul.mubr.msk.bf16.gmra.mrb[64].mxu0 %vm1278_vm5, %v1995_v61  ;;  %v1756_v44 = vadd.f32 %v3888_v56, %v3905_v9 }
 0x2fb   : > { %2147 = vmatprep.mubr.bf16.mxu0 %v3207_v28 }
 0x2fc   : > { %v1942_v42 = vadd.f32 %v3856_v48, %v1845_v29  ;;  %v2815_v45 = vpop.f32.mrb[48].mxu1  ;;  %v1983_v32 = vmax.f32 %v1939_v31, 0.0 }
 0x2fd   : > { %v2816_v4 = vpop.f32.mrb[49].mxu1 }
 0x2fe   : > { %v1984_v8 = vmax.f32 %v1942_v42, 0.0  ;;  %v2817_v20 = vadd.f32 %v2816_v4, %v2815_v45  ;;  %v2818_v33 = vpop.f32.mrb[50].mxu1 }
 0x2ff   : > { %v2819_v34 = vpop.f32.mrb[51].mxu1 }
 0x300   : > { %v1996_v35 = vpack.c.bf16 %v1984_v8, %v1983_v32  ;;  %v1850_v13 = vadd.f32 %v2817_v20, %v1753_v40  ;;  %v2820_v55 = vadd.f32 %v2819_v34, %v2818_v33 }
 0x302   : > { %v1947_v63 = vadd.f32 %v3862_v52, %v1850_v13  ;;  %v1853_v49 = vadd.f32 %v2820_v55, %v1756_v44  ;;  %2590 = vmatmul.mubr.msk.bf16.gmra.mrb[68].mxu0 %vm1278_vm5, %v1996_v35  ;;  %v1764_v52 = vadd.f32 %v3892_v25, %v3905_v9 }
 0x303   : > { %2157 = vmatprep.mubr.bf16.mxu0 %v3207_v28 }
 0x304   : > { %v1950_v48 = vadd.f32 %v3866_v53, %v1853_v49  ;;  %v2821_v30 = vpop.f32.mrb[52].mxu1  ;;  %v1985_v7 = vmax.f32 %v1947_v63, 0.0  ;;  %v3060_v63 = vld [vmem:[%s3394_s13 + $0x18] sm:$0xff] }
 0x305   : > { %v2822_v43 = vpop.f32.mrb[53].mxu1  ;;  %v344_v49 = vunpack.c.l.bf16 %v3060_v63 }
 0x306   : > { %v1986_v50 = vmax.f32 %v1950_v48, 0.0  ;;  %v2823_v56 = vadd.f32 %v2822_v43, %v2821_v30  ;;  %v2824_v51 = vpop.f32.mrb[54].mxu1  ;;  %v345_v43 = vunpack.c.h.bf16 %v3060_v63 }
 0x307   : > { %v2825_v57 = vpop.f32.mrb[55].mxu1 }
 0x308   : > { %v1997_v17 = vpack.c.bf16 %v1986_v50, %v1985_v7  ;;  %v1858_v2 = vadd.f32 %v2823_v56, %v1761_v60  ;;  %v2826_v59 = vadd.f32 %v2825_v57, %v2824_v51 }
 0x30a   : > { %v1955_v37 = vadd.f32 %v3860_v5, %v1858_v2  ;;  %v1861_v39 = vadd.f32 %v2826_v59, %v1764_v52  ;;  %2591 = vmatmul.mubr.msk.bf16.gmra.mrb[72].mxu0 %vm1278_vm5, %v1997_v17 }
 0x30c   : > { %v1958_v53 = vadd.f32 %v3864_v21, %v1861_v39  ;;  %v2827_v11 = vpop.f32.mrb[56].mxu1  ;;  %v1987_v14 = vmax.f32 %v1955_v37, 0.0  ;;  %v3061_v37 = vld [vmem:[%s3394_s13 + $0x20] sm:$0xff] }
 0x30d   : > { %v2828_v22 = vpop.f32.mrb[57].mxu1  ;;  %v346_v39 = vunpack.c.l.bf16 %v3061_v37 }
 0x30e   : > { %v1988_v15 = vmax.f32 %v1958_v53, 0.0  ;;  %v2829_v41 = vadd.f32 %v2828_v22, %v2827_v11  ;;  %v2830_v26 = vpop.f32.mrb[58].mxu1 }
 0x30f   : > { %v2831_v25 = vpop.f32.mrb[59].mxu1 }
 0x310   : > { %v1998_v16 = vpack.c.bf16 %v1988_v15, %v1987_v14  ;;  %v1866_v5 = vadd.f32 %v2829_v41, %v1769_v12  ;;  %v2832_v36 = vadd.f32 %v2831_v25, %v2830_v26  ;;  %v347_v12 = vunpack.c.h.bf16 %v3061_v37  ;;  %v3062_v41 = vld [vmem:[%s3394_s13 + $0x28] sm:$0xff] }
 0x311   : > { %v348_v26 = vunpack.c.l.bf16 %v3062_v41 }
 0x312   : > { %v1963_v18 = vadd.f32 %v3870_v3, %v1866_v5  ;;  %v1869_v23 = vadd.f32 %v2832_v36, %v1772_v38  ;;  %2592 = vmatmul.mubr.msk.bf16.vlgmr.msra.gmra.mrb[64].mxu1 %vm1278_vm5, %v1998_v16  ;;  %v1780_v3 = vadd.f32 %v3900_v6, %v3905_v9  ;;  %v2011_v6 = vlaneseq }
 0x313   : > { %2177 = vmatprep.mubr.bf16.mxu1 %v3207_v28  ;;  %v349_v5 = vunpack.c.h.bf16 %v3062_v41 }
 0x314   : > { %v1966_v21 = vadd.f32 %v3874_v1, %v1869_v23  ;;  %v2833_v46 = vpop.f32.mrb[60].mxu1  ;;  %v1989_v47 = vmax.f32 %v1963_v18, 0.0  ;;  %v2012_v9 = vshrl.u32 %v2011_v6, 7 }
 0x315   : > { %v2834_v19 = vpop.f32.mrb[61].mxu1 }
 0x316   : > { %v1990_v61 = vmax.f32 %v1966_v21, 0.0  ;;  %v2835_v54 = vadd.f32 %v2834_v19, %v2833_v46  ;;  %v2836_v24 = vpop.f32.mrb[62].mxu1  ;;  %v2013_v8 = vsub.s32 0, %v2012_v9  ;;  %v2017_v20 = vsub.s32 1, %v2012_v9 }
 0x317   : > { %v2837_v27 = vpop.f32.mrb[63].mxu1 }
 0x318   : > { %v1999_v31 = vpack.c.bf16 %v1990_v61, %v1989_v47  ;;  %v1874_v29 = vadd.f32 %v2835_v54, %v1777_v10  ;;  %v2838_v42 = vadd.f32 %v2837_v27, %v2836_v24  ;;  %v3063_v24 = vld [vmem:[%s3394_s13 + $0x30] sm:$0xff] }
 0x319   : > { %v350_v27 = vunpack.c.l.bf16 %v3063_v24 }
 0x31a   : > { %v1971_v45 = vadd.f32 %v3868_v62, %v1874_v29  ;;  %v1877_v1 = vadd.f32 %v2838_v42, %v1780_v3  ;;  %2593 = vmatmul.mubr.msk.bf16.gmra.mrb[68].mxu1 %vm1278_vm5, %v1999_v31  ;;  %v2009_v62 = vld [vmem:[%s4111_s6] sm:$0x3]  ;;  %v351_v42 = vunpack.c.h.bf16 %v3063_v24 }
 0x31b   : > { %2187 = vmatprep.mubr.bf16.mxu1 %v3207_v28  ;;  %v3968_v33 = vrot.slane %v2009_v62, %v2013_v8  ;;  %v3970_v28 = vrot.slane %v2009_v62, %v2017_v20 }
 0x31c   : > { %v1974_v58 = vadd.f32 %v3872_v0, %v1877_v1  ;;  %v1991_v4 = vmax.f32 %v1971_v45, 0.0  ;;  %v3059_v0 = vld [vmem:[%s3394_s13 + $0x10] sm:$0xff] }
 0x31d   : > { %v342_v34 = vunpack.c.l.bf16 %v3059_v0  ;;  %v343_v35 = vunpack.c.h.bf16 %v3059_v0 }
 0x31e   : > { %v1992_v40 = vmax.f32 %v1974_v58, 0.0  ;;  %v3064_v58 = vld [vmem:[%s3394_s13 + $0x38] sm:$0xff] }
 0x31f   : > { %v353_v9 = vunpack.c.h.bf16 %v3064_v58 }
 0x320   : > { %v2000_v32 = vpack.c.bf16 %v1992_v40, %v1991_v4  ;;  %v352_v4 = vunpack.c.l.bf16 %v3064_v58 }
 0x322   : > { %2594 = vmatmul.mubr.msk.bf16.gmra.mrb[72].mxu1 %vm1278_vm5, %v2000_v32 }
 0x3bd   : > { %v2119_v44 = vpop.f32.mrb[56].mxu0 }
 0x3be   : > { %v2120_v13 = vadd.f32 %v2119_v44, %v3968_v33  ;;  %v2121_v55 = vpop.f32.mrb[57].mxu0 }
 0x3bf   : > { %v2122_v48 = vadd.f32 %v2121_v55, %v3970_v28  ;;  %v2123_v30 = vpop.f32.mrb[58].mxu0 }
 0x3c0   : > { %v2198_v60 = vadd.f32 %v2120_v13, %v342_v34  ;;  %v2124_v7 = vadd.f32 %v2123_v30, %v3968_v33  ;;  %v2125_v50 = vpop.f32.mrb[59].mxu0 }
 0x3c1   : > { %v2199_v56 = vadd.f32 %v2122_v48, %v343_v35  ;;  %v2126_v51 = vadd.f32 %v2125_v50, %v3970_v28 }
 0x3c2   : > { %v2230_v57 = vmax.f32 %v2198_v60, 0.0  ;;  %v2200_v52 = vadd.f32 %v2124_v7, %v344_v49  ;;  %v3065_v49 = vld [vmem:[%s3394_s13 + $0x40] sm:$0xff] }
 0x3c3   : > { %v2231_v17 = vmax.f32 %v2199_v56, 0.0  ;;  %v2201_v2 = vadd.f32 %v2126_v51, %v345_v43  ;;  %v354_v48 = vunpack.c.l.bf16 %v3065_v49  ;;  %v355_v7 = vunpack.c.h.bf16 %v3065_v49  ;;  %v3066_v51 = vld [vmem:[%s3394_s13 + $0x48] sm:$0xff] }
 0x3c4   : > { %v2232_v59 = vmax.f32 %v2200_v52, 0.0 }
 0x3c5   : > { %v2618_v53 = vpack.c.bf16 %v2231_v17, %v2230_v57  ;;  %v2233_v11 = vmax.f32 %v2201_v2, 0.0  ;;  %v2129_v22 = vpop.f32.mrb[60].mxu0  ;;  %v356_v57 = vunpack.c.l.bf16 %v3066_v51 }
 0x3c6   : > { %v2130_v14 = vadd.f32 %v2129_v22, %v3968_v33  ;;  %v2131_v15 = vpop.f32.mrb[61].mxu0 }
 0x3c7   : > { %2358 = vst [vmem:[%s3984_s9] sm:$0xff] %v2618_v53  ;;  %v2619_v25 = vpack.c.bf16 %v2233_v11, %v2232_v59  ;;  %v2132_v38 = vadd.f32 %v2131_v15, %v3970_v28  ;;  %v2133_v16 = vpop.f32.mrb[62].mxu0  ;;  %v357_v59 = vunpack.c.h.bf16 %v3066_v51 }
 0x3c8   : > { %v2202_v36 = vadd.f32 %v2130_v14, %v346_v39  ;;  %v2134_v18 = vadd.f32 %v2133_v16, %v3968_v33  ;;  %v2135_v23 = vpop.f32.mrb[63].mxu0 }
 0x3c9   : > { %2359 = vst [vmem:[%s3984_s9 + $0x8] sm:$0xff] %v2619_v25  ;;  %v2203_v21 = vadd.f32 %v2132_v38, %v347_v12  ;;  %v2136_v46 = vadd.f32 %v2135_v23, %v3970_v28  ;;  %v3067_v25 = vld [vmem:[%s3394_s13 + $0x50] sm:$0xff] }
 0x3ca   : > { %v2234_v19 = vmax.f32 %v2202_v36, 0.0  ;;  %v2204_v10 = vadd.f32 %v2134_v18, %v348_v26  ;;  %v358_v38 = vunpack.c.l.bf16 %v3067_v25  ;;  %v359_v18 = vunpack.c.h.bf16 %v3067_v25 }
 0x3cb   : > { %v2235_v47 = vmax.f32 %v2203_v21, 0.0  ;;  %v2205_v61 = vadd.f32 %v2136_v46, %v349_v5  ;;  %v3068_v46 = vld [vmem:[%s3394_s13 + $0x58] sm:$0xff] }
 0x3cc   : > { %v2236_v54 = vmax.f32 %v2204_v10, 0.0 }
 0x3cd   : > { %v2620_v3 = vpack.c.bf16 %v2235_v47, %v2234_v19  ;;  %v2237_v31 = vmax.f32 %v2205_v61, 0.0  ;;  %v2139_v29 = vpop.f32.mrb[64].mxu0  ;;  %v360_v19 = vunpack.c.l.bf16 %v3068_v46 }
 0x3ce   : > { %v2140_v45 = vadd.f32 %v2139_v29, %v3968_v33  ;;  %v2141_v1 = vpop.f32.mrb[65].mxu0 }
 0x3cf   : > { %2360 = vst [vmem:[%s3984_s9 + $0x10] sm:$0xff] %v2620_v3  ;;  %v2621_v40 = vpack.c.bf16 %v2237_v31, %v2236_v54  ;;  %v2142_v32 = vadd.f32 %v2141_v1, %v3970_v28  ;;  %v2143_v6 = vpop.f32.mrb[66].mxu0  ;;  %v361_v54 = vunpack.c.h.bf16 %v3068_v46 }
 0x3d0   : > { %v2206_v8 = vadd.f32 %v2140_v45, %v350_v27  ;;  %v2144_v62 = vadd.f32 %v2143_v6, %v3968_v33  ;;  %v2145_v20 = vpop.f32.mrb[67].mxu0 }
 0x3d1   : > { %2361 = vst [vmem:[%s3984_s9 + $0x18] sm:$0xff] %v2621_v40  ;;  %v2207_v0 = vadd.f32 %v2142_v32, %v351_v42  ;;  %v2146_v34 = vadd.f32 %v2145_v20, %v3970_v28  ;;  %v3069_v40 = vld [vmem:[%s3394_s13 + $0x60] sm:$0xff] }
 0x3d2   : > { %v2238_v44 = vmax.f32 %v2206_v8, 0.0  ;;  %v2208_v35 = vadd.f32 %v2144_v62, %v352_v4  ;;  %v362_v32 = vunpack.c.l.bf16 %v3069_v40  ;;  %v363_v62 = vunpack.c.h.bf16 %v3069_v40 }
 0x3d3   : > { %v2239_v13 = vmax.f32 %v2207_v0, 0.0  ;;  %v2209_v55 = vadd.f32 %v2146_v34, %v353_v9  ;;  %v3070_v34 = vld [vmem:[%s3394_s13 + $0x68] sm:$0xff] }
 0x3d4   : > { %v2240_v63 = vmax.f32 %v2208_v35, 0.0 }
 0x3d5   : > { %v2622_v30 = vpack.c.bf16 %v2239_v13, %v2238_v44  ;;  %v2241_v43 = vmax.f32 %v2209_v55, 0.0  ;;  %v2149_v60 = vpop.f32.mrb[68].mxu0  ;;  %v364_v44 = vunpack.c.l.bf16 %v3070_v34 }
 0x3d6   : > { %v2150_v50 = vadd.f32 %v2149_v60, %v3968_v33  ;;  %v2151_v56 = vpop.f32.mrb[69].mxu0 }
 0x3d7   : > { %2362 = vst [vmem:[%s3984_s9 + $0x20] sm:$0xff] %v2622_v30  ;;  %v2623_v52 = vpack.c.bf16 %v2241_v43, %v2240_v63  ;;  %v2152_v17 = vadd.f32 %v2151_v56, %v3970_v28  ;;  %v2153_v2 = vpop.f32.mrb[70].mxu0  ;;  %v365_v63 = vunpack.c.h.bf16 %v3070_v34 }
 0x3d8   : > { %v2210_v37 = vadd.f32 %v2150_v50, %v354_v48  ;;  %v2154_v39 = vadd.f32 %v2153_v2, %v3968_v33  ;;  %v2155_v53 = vpop.f32.mrb[71].mxu0 }
 0x3d9   : > { %2363 = vst [vmem:[%s3984_s9 + $0x28] sm:$0xff] %v2623_v52  ;;  %v2211_v11 = vadd.f32 %v2152_v17, %v355_v7  ;;  %v2156_v22 = vadd.f32 %v2155_v53, %v3970_v28  ;;  %v3071_v52 = vld [vmem:[%s3394_s13 + $0x70] sm:$0xff] }
 0x3da   : > { %v2242_v12 = vmax.f32 %v2210_v37, 0.0  ;;  %v2212_v14 = vadd.f32 %v2154_v39, %v356_v57  ;;  %v366_v17 = vunpack.c.l.bf16 %v3071_v52  ;;  %v367_v39 = vunpack.c.h.bf16 %v3071_v52 }
 0x3db   : > { %v2243_v15 = vmax.f32 %v2211_v11, 0.0  ;;  %v2213_v41 = vadd.f32 %v2156_v22, %v357_v59  ;;  %v3072_v22 = vld [vmem:[%s3394_s13 + $0x78] sm:$0xff] }
 0x3dc   : > { %v2244_v26 = vmax.f32 %v2212_v14, 0.0 }
 0x3dd   : > { %v2624_v16 = vpack.c.bf16 %v2243_v15, %v2242_v12  ;;  %v2245_v5 = vmax.f32 %v2213_v41, 0.0  ;;  %v2159_v36 = vpop.f32.mrb[72].mxu0  ;;  %v368_v12 = vunpack.c.l.bf16 %v3072_v22 }
 0x3de   : > { %v2160_v23 = vadd.f32 %v2159_v36, %v3968_v33  ;;  %v2161_v21 = vpop.f32.mrb[73].mxu0 }
 0x3df   : > { %2364 = vst [vmem:[%s3984_s9 + $0x30] sm:$0xff] %v2624_v16  ;;  %v2625_v10 = vpack.c.bf16 %v2245_v5, %v2244_v26  ;;  %v2162_v47 = vadd.f32 %v2161_v21, %v3970_v28  ;;  %v2163_v61 = vpop.f32.mrb[74].mxu0  ;;  %v369_v26 = vunpack.c.h.bf16 %v3072_v22 }
 0x3e0   : > { %v2214_v24 = vadd.f32 %v2160_v23, %v358_v38  ;;  %v2164_v27 = vadd.f32 %v2163_v61, %v3968_v33  ;;  %v2165_v3 = vpop.f32.mrb[75].mxu0 }
 0x3e1   : > { %2365 = vst [vmem:[%s3984_s9 + $0x38] sm:$0xff] %v2625_v10  ;;  %v2215_v31 = vadd.f32 %v2162_v47, %v359_v18  ;;  %v2166_v29 = vadd.f32 %v2165_v3, %v3970_v28  ;;  %v3073_v10 = vld [vmem:[%s3394_s13 + $0x80] sm:$0xff] }
 0x3e2   : > { %v2246_v42 = vmax.f32 %v2214_v24, 0.0  ;;  %v2216_v45 = vadd.f32 %v2164_v27, %v360_v19  ;;  %v370_v47 = vunpack.c.l.bf16 %v3073_v10  ;;  %v371_v27 = vunpack.c.h.bf16 %v3073_v10 }
 0x3e3   : > { %v2247_v1 = vmax.f32 %v2215_v31, 0.0  ;;  %v2217_v58 = vadd.f32 %v2166_v29, %v361_v54  ;;  %v3074_v29 = vld [vmem:[%s3394_s13 + $0x88] sm:$0xff] }
 0x3e4   : > { %v2248_v4 = vmax.f32 %v2216_v45, 0.0 }
 0x3e5   : > { %v2626_v6 = vpack.c.bf16 %v2247_v1, %v2246_v42  ;;  %v2249_v9 = vmax.f32 %v2217_v58, 0.0  ;;  %v2169_v8 = vpop.f32.mrb[64].mxu1  ;;  %v372_v42 = vunpack.c.l.bf16 %v3074_v29 }
 0x3e6   : > { %v2170_v20 = vadd.f32 %v2169_v8, %v3968_v33  ;;  %v2171_v0 = vpop.f32.mrb[65].mxu1 }
 0x3e7   : > { %2366 = vst [vmem:[%s3984_s9 + $0x40] sm:$0xff] %v2626_v6  ;;  %v2627_v35 = vpack.c.bf16 %v2249_v9, %v2248_v4  ;;  %v2172_v13 = vadd.f32 %v2171_v0, %v3970_v28  ;;  %v2173_v55 = vpop.f32.mrb[66].mxu1  ;;  %v373_v4 = vunpack.c.h.bf16 %v3074_v29 }
 0x3e8   : > { %v2218_v49 = vadd.f32 %v2170_v20, %v362_v32  ;;  %v2174_v48 = vadd.f32 %v2173_v55, %v3968_v33  ;;  %v2175_v30 = vpop.f32.mrb[67].mxu1 }
 0x3e9   : > { %2367 = vst [vmem:[%s3984_s9 + $0x48] sm:$0xff] %v2627_v35  ;;  %v2219_v43 = vadd.f32 %v2172_v13, %v363_v62  ;;  %v2176_v60 = vadd.f32 %v2175_v30, %v3970_v28 }
 0x3ea   : > { %v2250_v7 = vmax.f32 %v2218_v49, 0.0  ;;  %v2220_v50 = vadd.f32 %v2174_v48, %v364_v44 }
 0x3eb   : > { %v2251_v56 = vmax.f32 %v2219_v43, 0.0  ;;  %v2221_v51 = vadd.f32 %v2176_v60, %v365_v63 }
 0x3ec   : > { %v2252_v57 = vmax.f32 %v2220_v50, 0.0 }
 0x3ed   : > { %v2628_v2 = vpack.c.bf16 %v2251_v56, %v2250_v7  ;;  %v2253_v59 = vmax.f32 %v2221_v51, 0.0  ;;  %v2179_v37 = vpop.f32.mrb[68].mxu1 }
 0x3ee   : > { %v2180_v53 = vadd.f32 %v2179_v37, %v3968_v33  ;;  %v2181_v11 = vpop.f32.mrb[69].mxu1 }
 0x3ef   : > { %2368 = vst [vmem:[%s3984_s9 + $0x50] sm:$0xff] %v2628_v2  ;;  %v2629_v14 = vpack.c.bf16 %v2253_v59, %v2252_v57  ;;  %v2182_v15 = vadd.f32 %v2181_v11, %v3970_v28  ;;  %v2183_v41 = vpop.f32.mrb[70].mxu1 }
 0x3f0   : > { %v2222_v25 = vadd.f32 %v2180_v53, %v366_v17  ;;  %v2184_v38 = vadd.f32 %v2183_v41, %v3968_v33  ;;  %v2185_v16 = vpop.f32.mrb[71].mxu1 }
 0x3f1   : > { %2369 = vst [vmem:[%s3984_s9 + $0x58] sm:$0xff] %v2629_v14  ;;  %v2223_v5 = vadd.f32 %v2182_v15, %v367_v39  ;;  %v2186_v36 = vadd.f32 %v2185_v16, %v3970_v28 }
 0x3f2   : > { %v2254_v18 = vmax.f32 %v2222_v25, 0.0  ;;  %v2224_v23 = vadd.f32 %v2184_v38, %v368_v12 }
 0x3f3   : > { %v2255_v21 = vmax.f32 %v2223_v5, 0.0  ;;  %v2225_v46 = vadd.f32 %v2186_v36, %v369_v26 }
 0x3f4   : > { %v2256_v19 = vmax.f32 %v2224_v23, 0.0 }
 0x3f5   : > { %v2630_v61 = vpack.c.bf16 %v2255_v21, %v2254_v18  ;;  %v2257_v54 = vmax.f32 %v2225_v46, 0.0  ;;  %v2189_v24 = vpop.f32.mrb[72].mxu1 }
 0x3f6   : > { %v2190_v3 = vadd.f32 %v2189_v24, %v3968_v33  ;;  %v2191_v31 = vpop.f32.mrb[73].mxu1 }
 0x3f7   : > { %2370 = vst [vmem:[%s3984_s9 + $0x60] sm:$0xff] %v2630_v61  ;;  %v2631_v45 = vpack.c.bf16 %v2257_v54, %v2256_v19  ;;  %v2192_v1 = vadd.f32 %v2191_v31, %v3970_v28  ;;  %v2193_v58 = vpop.f32.mrb[74].mxu1 }
 0x3f8   : > { %v2226_v40 = vadd.f32 %v2190_v3, %v370_v47  ;;  %v2194_v32 = vadd.f32 %v2193_v58, %v3968_v33  ;;  %v2195_v6 = vpop.f32.mrb[75].mxu1 }
 0x3f9   : > { %2371 = vst [vmem:[%s3984_s9 + $0x68] sm:$0xff] %v2631_v45  ;;  %v2227_v9 = vadd.f32 %v2192_v1, %v371_v27  ;;  %v2196_v8 = vadd.f32 %v2195_v6, %v3970_v28 }
 0x3fa   : > { %v2258_v62 = vmax.f32 %v2226_v40, 0.0  ;;  %v2228_v20 = vadd.f32 %v2194_v32, %v372_v42 }
 0x3fb   : > { %v2259_v0 = vmax.f32 %v2227_v9, 0.0  ;;  %v2229_v34 = vadd.f32 %v2196_v8, %v373_v4 }
 0x3fc   : > { %v2260_v44 = vmax.f32 %v2228_v20, 0.0 }
 0x3fd   : > { %v2632_v35 = vpack.c.bf16 %v2259_v0, %v2258_v62  ;;  %v2261_v13 = vmax.f32 %v2229_v34, 0.0 }
 0x3ff   : > { %2372 = vst [vmem:[%s3984_s9 + $0x70] sm:$0xff] %v2632_v35  ;;  %v2633_v33 = vpack.c.bf16 %v2261_v13, %v2260_v44 }
 0x401   : > { %2373 = vst [vmem:[%s3984_s9 + $0x78] sm:$0xff] %v2633_v33 }
 0x402   : > { %3116 = shalt.err (!%p3113_p13)
}
 0x403   : > { %s3117_s19 = scalar_lea.hbm %s4045_s11, 2048  ;;  %s3121_s22 = scalar_lea.hbm %s4112_s7, 8192 }
 0x404   : > { %p3118_p1 = scmp.ne.s32.totalorder %s4045_s11, %s3117_s19  ;;  %p3122_p8 = scmp.lt.u32.totalorder %s4045_s11, %s4112_s7 }
 0x405   : > { %p3123_p10 = scmp.lt.u32.totalorder %s3121_s22, %s3117_s19  ;;  %p3125_p0 = scmp.lt.u32.totalorder %s3117_s19, %s4045_s11 }
 0x406   : > { %p3119_p4 = pnand %p3118_p1, %p4134_p2 }
 0x407   : > { %p3124_p12 = por %p3123_p10, %p3122_p8 }
 0x408   : > { %p3120_p3 = pneg %p3119_p4 }
 0x409   : > { %p3126_p5 = por %p3125_p0, %p3124_p12 }
 0x40b   : > { %p3127_p6 = pnand %p3126_p5, %p3120_p3 }
 0x40d   : > { %3130 = shalt.err (!%p3127_p6)
}
 0x40e   : > { %s3209_s13 = smov 128   ;;  %s3210_s12 = smov 8  }
 0x40f   : > { %2889 = dma.vmem_to_hbm [thread:$0]  (%p4134_p2), %s4047_s28, 2048, %s4045_s11, %s4053_s14, %s3209_s13, %s3209_s13, %s3210_s12  }
 0x410 PF: > { %p2901_p7 = scmp.ge.s32.totalorder %s3201_s8, 2  ;;  %s2406_s18 = sand.u32 1, %s3173_s24  }
 0x411   : > { %p4135_p9 = scmp.ne.s32.totalorder %s4123_s16, 0  ;;  %s2407_s23 = scalar_lea.sflag [#allocation4], %s2406_s18 }
 0x413   : > { %p2896_p11 = pnand %p2901_p7, %p4135_p9 }
 0x415   : > { %3168 = dma.done.wait (!%p2896_p11), %s2407_s23, 2048  }
 0x416   : > { %3170 = vsyncadd (!%p2896_p11), %s2407_s23, 4294965248  ;;  %s21_s8 = sadd.s32 1, %s3201_s8   ;;  %s4136_s15 = sld [smem:[#allocation8_spill]] }
 0x417   : > { %p18_p13 = scmp.ge.s32.totalorder %s21_s8, 6   ;;  %s4137_s11 = sld [smem:[#allocation9_spill]] }
 0x418   : > { %s4138_s24 = smov %s3177_s25  ;;  %s4139_s25 = smov %s3181_s26 }
 0x419   : > { %s4140_s26 = smov %s3330_s21  ;;  %s4141_s27 = smov %s3193_s29 }
 0x41a   : > { %s4142_s28 = smov %s3197_s30  ;;  %20 = sbr.rel (!%p18_p13) target bundleno = 8 (0x8), region = 88 }
 0x41c   : > { %s4143_s29 = smov %s4136_s15 }
 0x41d   : > { %s4144_s30 = smov %s4137_s11 }
 0x421   :  { %2412 = vsyncpa [#allocation3], 1 }
 0x422   :  { %2414 = vsyncpa [#allocation3 + $0x1], 1 }
 0x423   :  { %2415 = vsyncpa [#allocation4], 1 }
 0x424   :  { %2417 = vsyncpa [#allocation4 + $0x1], 1 }

</bundles_post_ra>
